<compile_context>
chip_gen: v7x
topology: tpu7x:2x2x1
jax: 0.10.0
libtpu: 0.0.40
codegen_flags: <defaults>
</compile_context>

<pallas_src>
import functools

import jax
import jax.numpy as jnp
from jax import lax
from jax.experimental import pallas as pl
from jax.experimental.pallas import tpu as pltpu


_SUBLANE = 8     # batch (and weight-row) padding granularity (vreg sublanes)
_LANEPAD = 128   # hidden size padded up to a multiple of this (vreg lanes)


def _round_up(x, m):
    return ((x + m - 1) // m) * m


def _sigmoid(z):
    # sigmoid via tanh: lands on the EUP (transcendental) slot, avoids a VPU divide.
    return 0.5 * (jnp.tanh(0.5 * z) + 1.0)


# ------------------------------ kernel ------------------------------ #
def _bilstm_layer_kernel(xf_ref, xb_ref, wihf_ref, wihb_ref,
                         whhf_ref, whhb_ref, h0_ref, c0_ref,
                         outf_ref, outb_ref,
                         gxf_ref, gxb_ref, h_st, c_st,
                         *, seq_len, chunk_len):
    """One time chunk of a bidirectional LSTM layer (both directions fused).

    Grid: (num_chunks,), "arbitrary".  Grid step i handles forward chunk i and
    backward chunk num_chunks-1-i; (h, c) for both directions is carried across
    grid steps in persistent VMEM scratch (h_st, c_st).

    xf/xb         : (Tc*Bp, Fp)   bf16  input chunk (fwd / bwd chunk order), ones col for bias
    wihf/wihb     : (Fp, 4*Hp)    bf16  input->gate weights with bias row folded in
    whhf/whhb     : (Hp, 4*Hp)    bf16  hidden->gate weights
    h0/c0         : (2, Bp, Hp)   f32   initial state ([0]=fwd, [1]=bwd)
    outf/outb     : (Tc*Bp, Hp)   bf16  per-direction hidden outputs for this chunk
    gxf/gxb       : (Tc*Bp, 4*Hp) f32   scratch: per-chunk hoisted input projection
    h_st/c_st     : (2, Bp, Hp)   f32   persistent carried state
    """
    i = pl.program_id(0)
    nc = pl.num_programs(0)
    Hp = whhf_ref.shape[0]
    Bp = h0_ref.shape[1]
    Tc = chunk_len

    @pl.when(i == 0)
    def _():
        h_st[...] = h0_ref[...]
        c_st[...] = c0_ref[...]

    # Hoisted per-chunk input projection: one large MXU matmul per direction.
    # Bias is already folded in (ones column of x * bias row of wih).
    gxf_ref[...] = jnp.dot(xf_ref[...], wihf_ref[...],
                           preferred_element_type=jnp.float32)
    gxb_ref[...] = jnp.dot(xb_ref[...], wihb_ref[...],
                           preferred_element_type=jnp.float32)

    def gates_to_hc(gates, c):
        ig = _sigmoid(gates[:, 0 * Hp:1 * Hp])
        fg = _sigmoid(gates[:, 1 * Hp:2 * Hp])
        gg = jnp.tanh(gates[:, 2 * Hp:3 * Hp])
        og = _sigmoid(gates[:, 3 * Hp:4 * Hp])
        c_new = fg * c + ig * gg
        h_new = og * jnp.tanh(c_new)
        return h_new, c_new

    def body(s, carry):
        hf, cf, hb, cb = carry
        sb = Tc - 1 - s                                   # backward local step
        rf = pl.multiple_of(s * Bp, Bp)
        rb = pl.multiple_of(sb * Bp, Bp)
        # Two independent recurrent dots + gate blocks per iteration (fwd & bwd)
        # hide MXU/EUP latency on the serial recurrent chain (single-TC fusion).
        gf = gxf_ref[pl.ds(rf, Bp), :] + jnp.dot(
            hf.astype(jnp.bfloat16), whhf_ref[...],
            preferred_element_type=jnp.float32)
        gb = gxb_ref[pl.ds(rb, Bp), :] + jnp.dot(
            hb.astype(jnp.bfloat16), whhb_ref[...],
            preferred_element_type=jnp.float32)
        hf_new, cf_new = gates_to_hc(gf, cf)
        hb_new, cb_new = gates_to_hc(gb, cb)
        # Lane-aligned, Hp-wide (multiple of 128) bf16 stores at lane offset 0.
        outf_ref[pl.ds(rf, Bp), :] = hf_new.astype(outf_ref.dtype)
        outb_ref[pl.ds(rb, Bp), :] = hb_new.astype(outb_ref.dtype)
        # Time padding lives at the tail of the sequence, which the backward
        # direction visits first: freeze its state on padded steps.
        tb = (nc - 1 - i) * Tc + sb                       # global backward step
        keep = (tb < seq_len).astype(jnp.float32)
        hb_new = keep * hb_new + (1.0 - keep) * hb
        cb_new = keep * cb_new + (1.0 - keep) * cb
        return (hf_new, cf_new, hb_new, cb_new)

    hf, cf, hb, cb = lax.fori_loop(
        0, Tc, body, (h_st[0], c_st[0], h_st[1], c_st[1]))
    h_st[0] = hf
    c_st[0] = cf
    h_st[1] = hb
    c_st[1] = cb


# ------------------------------ launcher ------------------------------ #
def _run_bilstm_layer(x_flat, packed, h0, c0, *, seq_len, chunk_len, Bp, Hp):
    TBp, Fp = x_flat.shape
    rows = chunk_len * Bp
    nc = TBp // rows

    def lead_map(i):
        return (i, 0)

    def tail_map(i):
        return (nc - 1 - i, 0)

    def const2(i):
        return (0, 0)

    def const3(i):
        return (0, 0, 0)

    in_specs = [
        pl.BlockSpec((rows, Fp), lead_map),             # x, forward chunk order
        pl.BlockSpec((rows, Fp), tail_map),             # x, backward chunk order
        pl.BlockSpec((Fp, 4 * Hp), const2),             # wih fwd (+ bias row)
        pl.BlockSpec((Fp, 4 * Hp), const2),             # wih bwd (+ bias row)
        pl.BlockSpec((Hp, 4 * Hp), const2),             # whh fwd
        pl.BlockSpec((Hp, 4 * Hp), const2),             # whh bwd
        pl.BlockSpec((2, Bp, Hp), const3),              # h0
        pl.BlockSpec((2, Bp, Hp), const3),              # c0
    ]
    out_specs = [
        pl.BlockSpec((rows, Hp), lead_map),             # forward hidden outputs
        pl.BlockSpec((rows, Hp), tail_map),             # backward hidden outputs
    ]
    out_shape = [jax.ShapeDtypeStruct((TBp, Hp), jnp.bfloat16),
                 jax.ShapeDtypeStruct((TBp, Hp), jnp.bfloat16)]
    scratch_shapes = [
        pltpu.VMEM((rows, 4 * Hp), jnp.float32),        # gx fwd (per chunk)
        pltpu.VMEM((rows, 4 * Hp), jnp.float32),        # gx bwd (per chunk)
        pltpu.VMEM((2, Bp, Hp), jnp.float32),           # carried h state
        pltpu.VMEM((2, Bp, Hp), jnp.float32),           # carried c state
    ]

    # Explicit VMEM budget: gx scratch + double-buffered x/out chunks + resident
    # weights/state + headroom (chunk sizing keeps this well under v7x's 64 MiB).
    vmem_bytes = (2 * rows * 4 * Hp * 4
                  + 2 * 2 * rows * Fp * 2
                  + 2 * 2 * rows * Hp * 2
                  + 2 * (Fp + Hp) * 4 * Hp * 2
                  + 4 * 2 * Bp * Hp * 4
                  + (2 << 20))
    vmem_limit = int(min(max(vmem_bytes, 4 << 20), 96 << 20))

    kernel = functools.partial(_bilstm_layer_kernel,
                               seq_len=seq_len, chunk_len=chunk_len)
    out_f, out_b = pl.pallas_call(
        kernel,
        grid=(nc,),
        in_specs=in_specs,
        out_specs=out_specs,
        out_shape=out_shape,
        scratch_shapes=scratch_shapes,
        compiler_params=pltpu.CompilerParams(
            dimension_semantics=("arbitrary",),
            vmem_limit_bytes=vmem_limit),
    )(x_flat, x_flat, packed["wih_f"], packed["wih_b"],
      packed["whh_f"], packed["whh_b"], h0, c0)
    return out_f, out_b


# --------------------- parameter packing / padding --------------------- #
def _pad_gate_cols(w, H, Hp):
    # (..., 4*H) -> (..., 4*Hp): zero-pad each of the 4 gate blocks separately.
    lead = w.shape[:-1]
    w4 = w.reshape(lead + (4, H))
    w4 = jnp.pad(w4, [(0, 0)] * len(lead) + [(0, 0), (0, Hp - H)])
    return w4.reshape(lead + (4 * Hp,))


def _pack_layer_params(p, H, Hp, layer_index, f_pad):
    """Pack one layer's parameters; combined bias (b_ih + b_hh) is folded into
    the input->gate weights as the row multiplying x's ones column."""
    def pack_dir(wih, whh, b):
        wih = _pad_gate_cols(wih, H, Hp)                    # (f_in, 4Hp)
        b = _pad_gate_cols(b, H, Hp)                        # (1, 4Hp)
        packed = jnp.zeros((f_pad, 4 * Hp), jnp.float32)
        if layer_index == 0:
            f_in = wih.shape[0]
            packed = packed.at[:f_in].set(wih)
            packed = packed.at[f_in].set(b[0])              # bias row (ones col)
        else:
            # Previous layer output layout: [fwd h (Hp) | bwd h (Hp) | 1 | 0-pad].
            packed = packed.at[0:H].set(wih[0:H])
            packed = packed.at[Hp:Hp + H].set(wih[H:2 * H])
            packed = packed.at[2 * Hp].set(b[0])            # bias row (ones col)
        whh_p = jnp.pad(_pad_gate_cols(whh, H, Hp), ((0, Hp - H), (0, 0)))
        return packed.astype(jnp.bfloat16), whh_p.astype(jnp.bfloat16)

    wih_f, whh_f = pack_dir(p["wih_f"], p["whh_f"], p["b_f"])
    wih_b, whh_b = pack_dir(p["wih_b"], p["whh_b"], p["b_b"])
    return {"wih_f": wih_f, "wih_b": wih_b, "whh_f": whh_f, "whh_b": whh_b}


def _pad_state(s, Bp, Hp):
    # (2, B, H) -> (2, Bp, Hp)
    _, B, H = s.shape
    return jnp.pad(s.astype(jnp.float32), ((0, 0), (0, Bp - B), (0, Hp - H)))


def _choose_chunk_len(T, Bp, Hp, Fp_max, target_bytes=24 << 20):
    # Per-timestep VMEM footprint of one grid step: f32 gx (both dirs) plus
    # double-buffered bf16 x and out chunks (both dirs).
    per_t = Bp * (2 * 4 * Hp * 4 + 2 * 2 * Fp_max * 2 + 2 * 2 * Hp * 2)
    tc = max(int(target_bytes // max(per_t, 1)), 1)
    return max(1, min(tc, 512, T))


# ------------------------------ wrapper ------------------------------ #
def bilstm_forward(x, params, hc=None, chunk_len=None):
    """Equivalent of BiLSTM.forward (eval mode, dropout inactive).

    x: (batch, seq_len, input_features)
    returns: (batch, seq_len, 2 * recurrent_features)
    """
    B, T, F = x.shape
    H = params[0]["whh_f"].shape[0]
    L = len(params)
    Bp = _round_up(max(B, 1), _SUBLANE)
    Hp = _round_up(H, _LANEPAD)

    if hc is None:
        h = jnp.zeros((2 * L, B, H), jnp.float32)
        c = jnp.zeros((2 * L, B, H), jnp.float32)
    else:
        h, c = hc
        h = h.astype(jnp.float32)
        c = c.astype(jnp.float32)

    Fp0 = _round_up(F + 1, _SUBLANE)        # layer-0 input width (+ ones column)
    Fp_next = 2 * Hp + _SUBLANE             # deeper-layer input width (+ ones column)
    Fp_max = max(Fp0, Fp_next) if L > 1 else Fp0
    if chunk_len is None:
        chunk_len = _choose_chunk_len(T, Bp, Hp, Fp_max)
    chunk_len = max(1, min(int(chunk_len), T))
    Tp = _round_up(T, chunk_len)

    # Layer-0 input: cast to bf16 before the transpose/pad, go time-major,
    # pad batch/time, and append the bias ones column (+ zero pad to Fp0).
    x_t = jnp.transpose(x.astype(jnp.bfloat16), (1, 0, 2))         # (T, B, F)
    x_t = jnp.pad(x_t, ((0, Tp - T), (0, Bp - B), (0, 0)))         # (Tp, Bp, F)
    ones = jnp.ones((Tp, Bp, 1), jnp.bfloat16)
    zpad = jnp.zeros((Tp, Bp, Fp0 - F - 1), jnp.bfloat16)
    x_flat = jnp.concatenate([x_t, ones, zpad], axis=-1).reshape(Tp * Bp, Fp0)

    out_f = out_b = None
    for l, p in enumerate(params):
        packed = _pack_layer_params(p, H, Hp, layer_index=l,
                                    f_pad=x_flat.shape[1])
        h0 = _pad_state(h[2 * l:2 * l + 2], Bp, Hp)
        c0 = _pad_state(c[2 * l:2 * l + 2], Bp, Hp)
        out_f, out_b = _run_bilstm_layer(x_flat, packed, h0, c0,
                                         seq_len=T, chunk_len=chunk_len,
                                         Bp=Bp, Hp=Hp)
        if l + 1 < L:
            # Next-layer input = [fwd h | bwd h | 1 | 0-pad], already bf16/padded.
            # TODO(synk): fuse this concat into the next layer's kernel.
            ones2 = jnp.ones((Tp * Bp, 1), jnp.bfloat16)
            zpad2 = jnp.zeros((Tp * Bp, Fp_next - 2 * Hp - 1), jnp.bfloat16)
            x_flat = jnp.concatenate([out_f, out_b, ones2, zpad2], axis=-1)

    of = out_f.reshape(Tp, Bp, Hp)[:T, :B, :H].astype(jnp.float32)
    ob = out_b.reshape(Tp, Bp, Hp)[:T, :B, :H].astype(jnp.float32)
    out = jnp.concatenate([of, ob], axis=-1)      # (T, B, 2H)
    return jnp.transpose(out, (1, 0, 2))          # (B, T, 2H)


# ------------------------- pure-JAX reference ------------------------- #
def _ref_direction(x_tbf, wih, whh, b, h0, c0, reverse):
    H = whh.shape[0]

    def step(carry, x_t):
        h, c = carry
        gates = x_t @ wih + h @ whh + b
        i = jax.nn.sigmoid(gates[:, 0 * H:1 * H])
        f = jax.nn.sigmoid(gates[:, 1 * H:2 * H])
        g = jnp.tanh(gates[:, 2 * H:3 * H])
        o = jax.nn.sigmoid(gates[:, 3 * H:4 * H])
        c_new = f * c + i * g
        h_new = o * jnp.tanh(c_new)
        return (h_new, c_new), h_new

    _, hs = lax.scan(step, (h0, c0), x_tbf, reverse=reverse)
    return hs


def bilstm_reference(x, params, hc=None):
    B, T, _ = x.shape
    H = params[0]["whh_f"].shape[0]
    num_layers = len(params)
    if hc is None:
        h = jnp.zeros((2 * num_layers, B, H), jnp.float32)
        c = jnp.zeros((2 * num_layers, B, H), jnp.float32)
    else:
        h, c = hc
    x_tbf = jnp.transpose(x, (1, 0, 2)).astype(jnp.float32)
    for l, p in enumerate(params):
        of = _ref_direction(x_tbf, p["wih_f"], p["whh_f"], p["b_f"],
                            h[2 * l], c[2 * l], reverse=False)
        ob = _ref_direction(x_tbf, p["wih_b"], p["whh_b"], p["b_b"],
                            h[2 * l + 1], c[2 * l + 1], reverse=True)
        x_tbf = jnp.concatenate([of, ob], axis=-1)
    return jnp.transpose(x_tbf, (1, 0, 2))


# --------------------------- parameter init --------------------------- #
def init_bilstm_params(key, input_features, recurrent_features, num_layers=1):
    """Deterministic synthetic init, PyTorch-style uniform(-1/sqrt(H), 1/sqrt(H)).

    Weights stored pre-transposed: wih (F_in, 4H), whh (H, 4H); bias is the
    combined b_ih + b_hh, shape (1, 4H). Gate column order: i, f, g, o.
    """
    H = recurrent_features
    bound = 1.0 / jnp.sqrt(jnp.float32(H))
    params = []
    for l in range(num_layers):
        f_in = input_features if l == 0 else 2 * H
        layer = {}
        for d in ("f", "b"):
            key, k1, k2, k3 = jax.random.split(key, 4)
            layer[f"wih_{d}"] = jax.random.uniform(k1, (f_in, 4 * H), jnp.float32,
                                                   -bound, bound)
            layer[f"whh_{d}"] = jax.random.uniform(k2, (H, 4 * H), jnp.float32,
                                                   -bound, bound)
            layer[f"b_{d}"] = jax.random.uniform(k3, (1, 4 * H), jnp.float32,
                                                 -bound, bound)
        params.append(layer)
    return params


if __name__ == "__main__":
    batch = 2
    seq_len = 10          # deliberately NOT a multiple of the chunk length
    input_features = 16
    recurrent_features = 32
    num_layers = 2        # exercise the stacked / inter-layer path

    key = jax.random.PRNGKey(0)
    key, kx = jax.random.split(key)
    x = jax.random.normal(kx, (batch, seq_len, input_features), jnp.float32)
    params = init_bilstm_params(key, input_features, recurrent_features, num_layers)

    # chunk_len=4 -> 3 time chunks (last chunk time-padded): exercises the
    # carried-state grid pipeline and the padded-tail backward guard.
    out = jax.block_until_ready(bilstm_forward(x, params, hc=None, chunk_len=4))
    ref = jax.block_until_ready(bilstm_reference(x, params, hc=None))

    assert out.shape == (batch, seq_len, 2 * recurrent_features)
    # bf16 MXU operands / bf16 inter-layer activations with f32 accumulation.
    assert jnp.allclose(out, ref, rtol=2.5e-2, atol=2.5e-2), \
        float(jnp.max(jnp.abs(out - ref)))

    print("KERNEL_OK")
</pallas_src>

<mosaic_0001>
module attributes {stable_mosaic.version = 11 : i64} {
  func.func @_bilstm_layer_kernel(%arg0: i32, %arg1: memref<32x24xbf16, #tpu.memory_space<vmem>>, %arg2: memref<32x24xbf16, #tpu.memory_space<vmem>>, %arg3: memref<24x512xbf16, #tpu.memory_space<vmem>>, %arg4: memref<24x512xbf16, #tpu.memory_space<vmem>>, %arg5: memref<128x512xbf16, #tpu.memory_space<vmem>>, %arg6: memref<128x512xbf16, #tpu.memory_space<vmem>>, %arg7: memref<2x8x128xf32, #tpu.memory_space<vmem>>, %arg8: memref<2x8x128xf32, #tpu.memory_space<vmem>>, %arg9: memref<32x128xbf16, #tpu.memory_space<vmem>>, %arg10: memref<32x128xbf16, #tpu.memory_space<vmem>>, %arg11: memref<32x512xf32, #tpu.memory_space<vmem>>, %arg12: memref<32x512xf32, #tpu.memory_space<vmem>>, %arg13: memref<2x8x128xf32, #tpu.memory_space<vmem>>, %arg14: memref<2x8x128xf32, #tpu.memory_space<vmem>>) attributes {dimension_semantics = [#tpu.dimension_semantics<arbitrary>], iteration_bounds = array<i64: 3>, scalar_prefetch = 0 : i64, scratch_operands = 4 : i64, tpu.core_type = #tpu.core_type<tc>, window_params = [{transform_indices = @transform_0, window_bounds = array<i64: 32, 24>}, {transform_indices = @transform_1, window_bounds = array<i64: 32, 24>}, {pipeline_mode = #tpu.pipeline_mode<synchronous>, transform_indices = @transform_2, window_bounds = array<i64: 24, 512>}, {pipeline_mode = #tpu.pipeline_mode<synchronous>, transform_indices = @transform_3, window_bounds = array<i64: 24, 512>}, {pipeline_mode = #tpu.pipeline_mode<synchronous>, transform_indices = @transform_4, window_bounds = array<i64: 128, 512>}, {pipeline_mode = #tpu.pipeline_mode<synchronous>, transform_indices = @transform_5, window_bounds = array<i64: 128, 512>}, {pipeline_mode = #tpu.pipeline_mode<synchronous>, transform_indices = @transform_6, window_bounds = array<i64: 2, 8, 128>}, {pipeline_mode = #tpu.pipeline_mode<synchronous>, transform_indices = @transform_7, window_bounds = array<i64: 2, 8, 128>}, {transform_indices = @transform_8, window_bounds = array<i64: 32, 128>}, {transform_indices = @transform_9, window_bounds = array<i64: 32, 128>}]} {
    %c0_i32 = arith.constant 0 : i32
    %0 = arith.cmpi eq, %arg0, %c0_i32 : i32
    %1 = arith.extui %0 : i1 to i32
    %c0_i32_0 = arith.constant 0 : i32
    %2 = arith.cmpi ne, %1, %c0_i32_0 : i32
    scf.if %2 {
      %c0_38 = arith.constant 0 : index
      %c0_39 = arith.constant 0 : index
      %c0_40 = arith.constant 0 : index
      %33 = vector.load %arg7[%c0_38, %c0_39, %c0_40] : memref<2x8x128xf32, #tpu.memory_space<vmem>>, vector<2x8x128xf32>
      %c0_41 = arith.constant 0 : index
      %c0_42 = arith.constant 0 : index
      %c0_43 = arith.constant 0 : index
      %34 = vector.load %arg13[%c0_41, %c0_42, %c0_43] : memref<2x8x128xf32, #tpu.memory_space<vmem>>, vector<2x8x128xf32>
      tpu.vector_store %arg13[%c0_41, %c0_42, %c0_43], %33 {strides = array<i32>} : memref<2x8x128xf32, #tpu.memory_space<vmem>>, vector<2x8x128xf32>,
      %c0_44 = arith.constant 0 : index
      %c0_45 = arith.constant 0 : index
      %c0_46 = arith.constant 0 : index
      %35 = vector.load %arg8[%c0_44, %c0_45, %c0_46] : memref<2x8x128xf32, #tpu.memory_space<vmem>>, vector<2x8x128xf32>
      %c0_47 = arith.constant 0 : index
      %c0_48 = arith.constant 0 : index
      %c0_49 = arith.constant 0 : index
      %36 = vector.load %arg14[%c0_47, %c0_48, %c0_49] : memref<2x8x128xf32, #tpu.memory_space<vmem>>, vector<2x8x128xf32>
      tpu.vector_store %arg14[%c0_47, %c0_48, %c0_49], %35 {strides = array<i32>} : memref<2x8x128xf32, #tpu.memory_space<vmem>>, vector<2x8x128xf32>,
    } else {
    }
    %c0 = arith.constant 0 : index
    %c0_1 = arith.constant 0 : index
    %3 = vector.load %arg1[%c0, %c0_1] : memref<32x24xbf16, #tpu.memory_space<vmem>>, vector<32x24xbf16>
    %c0_2 = arith.constant 0 : index
    %c0_3 = arith.constant 0 : index
    %4 = vector.load %arg3[%c0_2, %c0_3] : memref<24x512xbf16, #tpu.memory_space<vmem>>, vector<24x512xbf16>
    %cst = arith.constant dense<0.000000e+00> : vector<32x512xf32>
    %5 = tpu.matmul %3, %4, %cst {dimension_numbers = #tpu.dot_dimension_numbers<[1], [0], [0], [1], [0, 0, 1, 1], [], []>} : vector<32x24xbf16>, vector<24x512xbf16>, vector<32x512xf32> -> vector<32x512xf32>
    %c0_4 = arith.constant 0 : index
    %c0_5 = arith.constant 0 : index
    %6 = vector.load %arg11[%c0_4, %c0_5] : memref<32x512xf32, #tpu.memory_space<vmem>>, vector<32x512xf32>
    tpu.vector_store %arg11[%c0_4, %c0_5], %5 {strides = array<i32>} : memref<32x512xf32, #tpu.memory_space<vmem>>, vector<32x512xf32>,
    %c0_6 = arith.constant 0 : index
    %c0_7 = arith.constant 0 : index
    %7 = vector.load %arg2[%c0_6, %c0_7] : memref<32x24xbf16, #tpu.memory_space<vmem>>, vector<32x24xbf16>
    %c0_8 = arith.constant 0 : index
    %c0_9 = arith.constant 0 : index
    %8 = vector.load %arg4[%c0_8, %c0_9] : memref<24x512xbf16, #tpu.memory_space<vmem>>, vector<24x512xbf16>
    %cst_10 = arith.constant dense<0.000000e+00> : vector<32x512xf32>
    %9 = tpu.matmul %7, %8, %cst_10 {dimension_numbers = #tpu.dot_dimension_numbers<[1], [0], [0], [1], [0, 0, 1, 1], [], []>} : vector<32x24xbf16>, vector<24x512xbf16>, vector<32x512xf32> -> vector<32x512xf32>
    %c0_11 = arith.constant 0 : index
    %c0_12 = arith.constant 0 : index
    %10 = vector.load %arg12[%c0_11, %c0_12] : memref<32x512xf32, #tpu.memory_space<vmem>>, vector<32x512xf32>
    tpu.vector_store %arg12[%c0_11, %c0_12], %9 {strides = array<i32>} : memref<32x512xf32, #tpu.memory_space<vmem>>, vector<32x512xf32>,
    %c0_13 = arith.constant 0 : index
    %c0_14 = arith.constant 0 : index
    %c0_15 = arith.constant 0 : index
    %11 = vector.load %arg13[%c0_13, %c0_14, %c0_15] : memref<2x8x128xf32, #tpu.memory_space<vmem>>, vector<1x8x128xf32>
    %12 = vector.shape_cast %11 : vector<1x8x128xf32> to vector<8x128xf32>
    %c0_16 = arith.constant 0 : index
    %c0_17 = arith.constant 0 : index
    %c0_18 = arith.constant 0 : index
    %13 = vector.load %arg14[%c0_16, %c0_17, %c0_18] : memref<2x8x128xf32, #tpu.memory_space<vmem>>, vector<1x8x128xf32>
    %14 = vector.shape_cast %13 : vector<1x8x128xf32> to vector<8x128xf32>
    %c1 = arith.constant 1 : index
    %c0_19 = arith.constant 0 : index
    %c0_20 = arith.constant 0 : index
    %15 = vector.load %arg13[%c1, %c0_19, %c0_20] : memref<2x8x128xf32, #tpu.memory_space<vmem>>, vector<1x8x128xf32>
    %16 = vector.shape_cast %15 : vector<1x8x128xf32> to vector<8x128xf32>
    %c1_21 = arith.constant 1 : index
    %c0_22 = arith.constant 0 : index
    %c0_23 = arith.constant 0 : index
    %17 = vector.load %arg14[%c1_21, %c0_22, %c0_23] : memref<2x8x128xf32, #tpu.memory_space<vmem>>, vector<1x8x128xf32>
    %18 = vector.shape_cast %17 : vector<1x8x128xf32> to vector<8x128xf32>
    %c0_i32_24 = arith.constant 0 : i32
    %c4_i32 = arith.constant 4 : i32
    %19 = arith.addi %c0_i32_24, %c4_i32 : i32
    %c1_i32 = arith.constant 1 : i32
    %20:4 = scf.for %arg15 = %c0_i32_24 to %19 step %c1_i32 iter_args(%arg16 = %12, %arg17 = %14, %arg18 = %16, %arg19 = %18) -> (vector<8x128xf32>, vector<8x128xf32>, vector<8x128xf32>, vector<8x128xf32>)  : i32 {
      %c3_i32 = arith.constant 3 : i32
      %33 = arith.subi %c3_i32, %arg15 : i32
      %c8_i32 = arith.constant 8 : i32
      %34 = arith.muli %arg15, %c8_i32 : i32
      %35 = tpu.assume_multiple %34, 8 : i32
      %c8_i32_38 = arith.constant 8 : i32
      %36 = arith.muli %33, %c8_i32_38 : i32
      %37 = tpu.assume_multiple %36, 8 : i32
      %38 = arith.index_cast %35 : i32 to index
      %c0_39 = arith.constant 0 : index
      %39 = vector.load %arg11[%38, %c0_39] : memref<32x512xf32, #tpu.memory_space<vmem>>, vector<8x512xf32>
      %40 = arith.truncf %arg16 : vector<8x128xf32> to vector<8x128xbf16>
      %c0_40 = arith.constant 0 : index
      %c0_41 = arith.constant 0 : index
      %41 = vector.load %arg5[%c0_40, %c0_41] : memref<128x512xbf16, #tpu.memory_space<vmem>>, vector<128x512xbf16>
      %cst_42 = arith.constant dense<0.000000e+00> : vector<8x512xf32>
      %42 = tpu.matmul %40, %41, %cst_42 {dimension_numbers = #tpu.dot_dimension_numbers<[1], [0], [0], [1], [0, 0, 1, 1], [], []>} : vector<8x128xbf16>, vector<128x512xbf16>, vector<8x512xf32> -> vector<8x512xf32>
      %43 = arith.addf %39, %42 : vector<8x512xf32>
      %44 = arith.index_cast %37 : i32 to index
      %c0_43 = arith.constant 0 : index
      %45 = vector.load %arg12[%44, %c0_43] : memref<32x512xf32, #tpu.memory_space<vmem>>, vector<8x512xf32>
      %46 = arith.truncf %arg18 : vector<8x128xf32> to vector<8x128xbf16>
      %c0_44 = arith.constant 0 : index
      %c0_45 = arith.constant 0 : index
      %47 = vector.load %arg6[%c0_44, %c0_45] : memref<128x512xbf16, #tpu.memory_space<vmem>>, vector<128x512xbf16>
      %cst_46 = arith.constant dense<0.000000e+00> : vector<8x512xf32>
      %48 = tpu.matmul %46, %47, %cst_46 {dimension_numbers = #tpu.dot_dimension_numbers<[1], [0], [0], [1], [0, 0, 1, 1], [], []>} : vector<8x128xbf16>, vector<128x512xbf16>, vector<8x512xf32> -> vector<8x512xf32>
      %49 = arith.addf %45, %48 : vector<8x512xf32>
      %50 = vector.extract_strided_slice %43 {offsets = [0, 0], sizes = [8, 128], strides = [1, 1]} : vector<8x512xf32> to vector<8x128xf32>
      %cst_47 = arith.constant 5.000000e-01 : f32
      %51 = vector.broadcast %cst_47 : f32 to vector<8x128xf32>
      %52 = arith.mulf %51, %50 : vector<8x128xf32>
      %53 = math.tanh %52 : vector<8x128xf32>
      %cst_48 = arith.constant 1.000000e+00 : f32
      %54 = vector.broadcast %cst_48 : f32 to vector<8x128xf32>
      %55 = arith.addf %53, %54 : vector<8x128xf32>
      %cst_49 = arith.constant 5.000000e-01 : f32
      %56 = vector.broadcast %cst_49 : f32 to vector<8x128xf32>
      %57 = arith.mulf %56, %55 : vector<8x128xf32>
      %58 = vector.extract_strided_slice %43 {offsets = [0, 128], sizes = [8, 128], strides = [1, 1]} : vector<8x512xf32> to vector<8x128xf32>
      %cst_50 = arith.constant 5.000000e-01 : f32
      %59 = vector.broadcast %cst_50 : f32 to vector<8x128xf32>
      %60 = arith.mulf %59, %58 : vector<8x128xf32>
      %61 = math.tanh %60 : vector<8x128xf32>
      %cst_51 = arith.constant 1.000000e+00 : f32
      %62 = vector.broadcast %cst_51 : f32 to vector<8x128xf32>
      %63 = arith.addf %61, %62 : vector<8x128xf32>
      %cst_52 = arith.constant 5.000000e-01 : f32
      %64 = vector.broadcast %cst_52 : f32 to vector<8x128xf32>
      %65 = arith.mulf %64, %63 : vector<8x128xf32>
      %66 = vector.extract_strided_slice %43 {offsets = [0, 256], sizes = [8, 128], strides = [1, 1]} : vector<8x512xf32> to vector<8x128xf32>
      %67 = math.tanh %66 : vector<8x128xf32>
      %68 = vector.extract_strided_slice %43 {offsets = [0, 384], sizes = [8, 128], strides = [1, 1]} : vector<8x512xf32> to vector<8x128xf32>
      %cst_53 = arith.constant 5.000000e-01 : f32
      %69 = vector.broadcast %cst_53 : f32 to vector<8x128xf32>
      %70 = arith.mulf %69, %68 : vector<8x128xf32>
      %71 = math.tanh %70 : vector<8x128xf32>
      %cst_54 = arith.constant 1.000000e+00 : f32
      %72 = vector.broadcast %cst_54 : f32 to vector<8x128xf32>
      %73 = arith.addf %71, %72 : vector<8x128xf32>
      %cst_55 = arith.constant 5.000000e-01 : f32
      %74 = vector.broadcast %cst_55 : f32 to vector<8x128xf32>
      %75 = arith.mulf %74, %73 : vector<8x128xf32>
      %76 = arith.mulf %65, %arg17 : vector<8x128xf32>
      %77 = arith.mulf %57, %67 : vector<8x128xf32>
      %78 = arith.addf %76, %77 : vector<8x128xf32>
      %79 = math.tanh %78 : vector<8x128xf32>
      %80 = arith.mulf %75, %79 : vector<8x128xf32>
      %81 = vector.extract_strided_slice %49 {offsets = [0, 0], sizes = [8, 128], strides = [1, 1]} : vector<8x512xf32> to vector<8x128xf32>
      %cst_56 = arith.constant 5.000000e-01 : f32
      %82 = vector.broadcast %cst_56 : f32 to vector<8x128xf32>
      %83 = arith.mulf %82, %81 : vector<8x128xf32>
      %84 = math.tanh %83 : vector<8x128xf32>
      %cst_57 = arith.constant 1.000000e+00 : f32
      %85 = vector.broadcast %cst_57 : f32 to vector<8x128xf32>
      %86 = arith.addf %84, %85 : vector<8x128xf32>
      %cst_58 = arith.constant 5.000000e-01 : f32
      %87 = vector.broadcast %cst_58 : f32 to vector<8x128xf32>
      %88 = arith.mulf %87, %86 : vector<8x128xf32>
      %89 = vector.extract_strided_slice %49 {offsets = [0, 128], sizes = [8, 128], strides = [1, 1]} : vector<8x512xf32> to vector<8x128xf32>
      %cst_59 = arith.constant 5.000000e-01 : f32
      %90 = vector.broadcast %cst_59 : f32 to vector<8x128xf32>
      %91 = arith.mulf %90, %89 : vector<8x128xf32>
      %92 = math.tanh %91 : vector<8x128xf32>
      %cst_60 = arith.constant 1.000000e+00 : f32
      %93 = vector.broadcast %cst_60 : f32 to vector<8x128xf32>
      %94 = arith.addf %92, %93 : vector<8x128xf32>
      %cst_61 = arith.constant 5.000000e-01 : f32
      %95 = vector.broadcast %cst_61 : f32 to vector<8x128xf32>
      %96 = arith.mulf %95, %94 : vector<8x128xf32>
      %97 = vector.extract_strided_slice %49 {offsets = [0, 256], sizes = [8, 128], strides = [1, 1]} : vector<8x512xf32> to vector<8x128xf32>
      %98 = math.tanh %97 : vector<8x128xf32>
      %99 = vector.extract_strided_slice %49 {offsets = [0, 384], sizes = [8, 128], strides = [1, 1]} : vector<8x512xf32> to vector<8x128xf32>
      %cst_62 = arith.constant 5.000000e-01 : f32
      %100 = vector.broadcast %cst_62 : f32 to vector<8x128xf32>
      %101 = arith.mulf %100, %99 : vector<8x128xf32>
      %102 = math.tanh %101 : vector<8x128xf32>
      %cst_63 = arith.constant 1.000000e+00 : f32
      %103 = vector.broadcast %cst_63 : f32 to vector<8x128xf32>
      %104 = arith.addf %102, %103 : vector<8x128xf32>
      %cst_64 = arith.constant 5.000000e-01 : f32
      %105 = vector.broadcast %cst_64 : f32 to vector<8x128xf32>
      %106 = arith.mulf %105, %104 : vector<8x128xf32>
      %107 = arith.mulf %96, %arg19 : vector<8x128xf32>
      %108 = arith.mulf %88, %98 : vector<8x128xf32>
      %109 = arith.addf %107, %108 : vector<8x128xf32>
      %110 = math.tanh %109 : vector<8x128xf32>
      %111 = arith.mulf %106, %110 : vector<8x128xf32>
      %112 = arith.truncf %80 : vector<8x128xf32> to vector<8x128xbf16>
      %113 = arith.index_cast %35 : i32 to index
      %c0_65 = arith.constant 0 : index
      %114 = vector.load %arg9[%113, %c0_65] : memref<32x128xbf16, #tpu.memory_space<vmem>>, vector<8x128xbf16>
      tpu.vector_store %arg9[%113, %c0_65], %112 {strides = array<i32>} : memref<32x128xbf16, #tpu.memory_space<vmem>>, vector<8x128xbf16>,
      %115 = arith.truncf %111 : vector<8x128xf32> to vector<8x128xbf16>
      %116 = arith.index_cast %37 : i32 to index
      %c0_66 = arith.constant 0 : index
      %117 = vector.load %arg10[%116, %c0_66] : memref<32x128xbf16, #tpu.memory_space<vmem>>, vector<8x128xbf16>
      tpu.vector_store %arg10[%116, %c0_66], %115 {strides = array<i32>} : memref<32x128xbf16, #tpu.memory_space<vmem>>, vector<8x128xbf16>,
      %c2_i32 = arith.constant 2 : i32
      %118 = arith.subi %c2_i32, %arg0 : i32
      %c4_i32_67 = arith.constant 4 : i32
      %119 = arith.muli %118, %c4_i32_67 : i32
      %120 = arith.addi %119, %33 : i32
      %c10_i32 = arith.constant 10 : i32
      %121 = arith.cmpi slt, %120, %c10_i32 : i32
      %122 = arith.extui %121 : i1 to i32
      %123 = arith.sitofp %122 : i32 to f32
      %124 = vector.broadcast %123 : f32 to vector<8x128xf32>
      %125 = arith.mulf %124, %111 : vector<8x128xf32>
      %cst_68 = arith.constant 1.000000e+00 : f32
      %126 = arith.subf %cst_68, %123 : f32
      %127 = vector.broadcast %126 : f32 to vector<8x128xf32>
      %128 = arith.mulf %127, %arg18 : vector<8x128xf32>
      %129 = arith.addf %125, %128 : vector<8x128xf32>
      %130 = vector.broadcast %123 : f32 to vector<8x128xf32>
      %131 = arith.mulf %130, %109 : vector<8x128xf32>
      %cst_69 = arith.constant 1.000000e+00 : f32
      %132 = arith.subf %cst_69, %123 : f32
      %133 = vector.broadcast %132 : f32 to vector<8x128xf32>
      %134 = arith.mulf %133, %arg19 : vector<8x128xf32>
      %135 = arith.addf %131, %134 : vector<8x128xf32>
      scf.yield %80, %78, %129, %135 : vector<8x128xf32>, vector<8x128xf32>, vector<8x128xf32>, vector<8x128xf32>
    }
    %c4_i32_25 = arith.constant 4 : i32
    %c0_26 = arith.constant 0 : index
    %c0_27 = arith.constant 0 : index
    %c0_28 = arith.constant 0 : index
    %21 = vector.load %arg13[%c0_26, %c0_27, %c0_28] : memref<2x8x128xf32, #tpu.memory_space<vmem>>, vector<1x8x128xf32>
    %22 = vector.shape_cast %21 : vector<1x8x128xf32> to vector<8x128xf32>
    %23 = vector.shape_cast %20#0 : vector<8x128xf32> to vector<1x8x128xf32>
    tpu.vector_store %arg13[%c0_26, %c0_27, %c0_28], %23 {strides = array<i32>} : memref<2x8x128xf32, #tpu.memory_space<vmem>>, vector<1x8x128xf32>,
    %c0_29 = arith.constant 0 : index
    %c0_30 = arith.constant 0 : index
    %c0_31 = arith.constant 0 : index
    %24 = vector.load %arg14[%c0_29, %c0_30, %c0_31] : memref<2x8x128xf32, #tpu.memory_space<vmem>>, vector<1x8x128xf32>
    %25 = vector.shape_cast %24 : vector<1x8x128xf32> to vector<8x128xf32>
    %26 = vector.shape_cast %20#1 : vector<8x128xf32> to vector<1x8x128xf32>
    tpu.vector_store %arg14[%c0_29, %c0_30, %c0_31], %26 {strides = array<i32>} : memref<2x8x128xf32, #tpu.memory_space<vmem>>, vector<1x8x128xf32>,
    %c1_32 = arith.constant 1 : index
    %c0_33 = arith.constant 0 : index
    %c0_34 = arith.constant 0 : index
    %27 = vector.load %arg13[%c1_32, %c0_33, %c0_34] : memref<2x8x128xf32, #tpu.memory_space<vmem>>, vector<1x8x128xf32>
    %28 = vector.shape_cast %27 : vector<1x8x128xf32> to vector<8x128xf32>
    %29 = vector.shape_cast %20#2 : vector<8x128xf32> to vector<1x8x128xf32>
    tpu.vector_store %arg13[%c1_32, %c0_33, %c0_34], %29 {strides = array<i32>} : memref<2x8x128xf32, #tpu.memory_space<vmem>>, vector<1x8x128xf32>,
    %c1_35 = arith.constant 1 : index
    %c0_36 = arith.constant 0 : index
    %c0_37 = arith.constant 0 : index
    %30 = vector.load %arg14[%c1_35, %c0_36, %c0_37] : memref<2x8x128xf32, #tpu.memory_space<vmem>>, vector<1x8x128xf32>
    %31 = vector.shape_cast %30 : vector<1x8x128xf32> to vector<8x128xf32>
    %32 = vector.shape_cast %20#3 : vector<8x128xf32> to vector<1x8x128xf32>
    tpu.vector_store %arg14[%c1_35, %c0_36, %c0_37], %32 {strides = array<i32>} : memref<2x8x128xf32, #tpu.memory_space<vmem>>, vector<1x8x128xf32>,
    return
  }
  func.func @transform_0(%arg0: i32) -> (i32, i32) {
    %c0_i32 = arith.constant 0 : i32
    %c0_i32_0 = arith.constant 0 : i32
    return %arg0, %c0_i32 : i32, i32
  }
  func.func @transform_1(%arg0: i32) -> (i32, i32) {
    %c2_i32 = arith.constant 2 : i32
    %0 = arith.subi %c2_i32, %arg0 : i32
    %c0_i32 = arith.constant 0 : i32
    %c0_i32_0 = arith.constant 0 : i32
    return %0, %c0_i32 : i32, i32
  }
  func.func @transform_2(%arg0: i32) -> (i32, i32) {
    %c0_i32 = arith.constant 0 : i32
    %c0_i32_0 = arith.constant 0 : i32
    %c0_i32_1 = arith.constant 0 : i32
    return %c0_i32, %c0_i32_0 : i32, i32
  }
  func.func @transform_3(%arg0: i32) -> (i32, i32) {
    %c0_i32 = arith.constant 0 : i32
    %c0_i32_0 = arith.constant 0 : i32
    %c0_i32_1 = arith.constant 0 : i32
    return %c0_i32, %c0_i32_0 : i32, i32
  }
  func.func @transform_4(%arg0: i32) -> (i32, i32) {
    %c0_i32 = arith.constant 0 : i32
    %c0_i32_0 = arith.constant 0 : i32
    %c0_i32_1 = arith.constant 0 : i32
    return %c0_i32, %c0_i32_0 : i32, i32
  }
  func.func @transform_5(%arg0: i32) -> (i32, i32) {
    %c0_i32 = arith.constant 0 : i32
    %c0_i32_0 = arith.constant 0 : i32
    %c0_i32_1 = arith.constant 0 : i32
    return %c0_i32, %c0_i32_0 : i32, i32
  }
  func.func @transform_6(%arg0: i32) -> (i32, i32, i32) {
    %c0_i32 = arith.constant 0 : i32
    %c0_i32_0 = arith.constant 0 : i32
    %c0_i32_1 = arith.constant 0 : i32
    %c0_i32_2 = arith.constant 0 : i32
    return %c0_i32, %c0_i32_0, %c0_i32_1 : i32, i32, i32
  }
  func.func @transform_7(%arg0: i32) -> (i32, i32, i32) {
    %c0_i32 = arith.constant 0 : i32
    %c0_i32_0 = arith.constant 0 : i32
    %c0_i32_1 = arith.constant 0 : i32
    %c0_i32_2 = arith.constant 0 : i32
    return %c0_i32, %c0_i32_0, %c0_i32_1 : i32, i32, i32
  }
  func.func @transform_8(%arg0: i32) -> (i32, i32) {
    %c0_i32 = arith.constant 0 : i32
    %c0_i32_0 = arith.constant 0 : i32
    return %arg0, %c0_i32 : i32, i32
  }
  func.func @transform_9(%arg0: i32) -> (i32, i32) {
    %c2_i32 = arith.constant 2 : i32
    %0 = arith.subi %c2_i32, %arg0 : i32
    %c0_i32 = arith.constant 0 : i32
    %c0_i32_0 = arith.constant 0 : i32
    return %0, %c0_i32 : i32, i32
  }
}

</mosaic_0001>

<bundles_post_ra>
// kernel: tpu_custom_call.1
= control target key start
LH: loop header
LB: loop body
LE: loop exit
PB: predicated region body
PF: predicated region fallthrough
CT: control target
= control target key end

     0   :  { %s2798_s0 = inlined_call_operand.vmem [shape: bf16[96,24], index: 0, kind: input, shape index: {}]   ;;  %s2799_s1 = inlined_call_operand.vmem [shape: bf16[96,24], index: 1, kind: input, shape index: {}]   ;;  %s2800_s2 = inlined_call_operand.vmem [shape: bf16[24,512], index: 2, kind: input, shape index: {}]   ;;  %s2801_s3 = inlined_call_operand.vmem [shape: bf16[24,512], index: 3, kind: input, shape index: {}]   ;;  %s2802_s4 = inlined_call_operand.hbm [shape: bf16[128,512], index: 4, kind: input, shape index: {}]   ;;  %s2803_s5 = inlined_call_operand.hbm [shape: bf16[128,512], index: 5, kind: input, shape index: {}]   ;;  %s2804_s6 = inlined_call_operand.vmem [shape: f32[2,8,128], index: 6, kind: input, shape index: {}]   ;;  %s2805_s7 = inlined_call_operand.vmem [shape: f32[2,8,128], index: 7, kind: input, shape index: {}]   ;;  %s2806_s8 = inlined_call_operand.hbm [shape: bf16[96,128], index: 8, kind: output, shape index: {0}]   ;;  %s2807_s9 = inlined_call_operand.hbm [shape: bf16[96,128], index: 9, kind: output, shape index: {1}]  }
   0x1   :  { %2824 = sst [smem:[#allocation28_spill]] %s2802_s4 }
   0x2   :  { %2825 = sst [smem:[#allocation29_spill]] %s2803_s5 }
   0x3   :  { %15 = vsyncpa [#allocation7], 0 }
   0x4   :  { %16 = vsyncpa [#allocation10], 0 }
   0x5   :  { %17 = vsyncpa [#allocation8], 0 }
   0x6   :  { %19 = vsyncpa [#allocation8 + $0x1], 0 }
   0x7   :  { %20 = vsyncpa [#allocation13], 0 }
   0x8   :  { %22 = vsyncpa [#allocation13 + $0x1], 0  ;;  %s2341_s30 = smov 0   ;;  %s2343_s10 = smov 0  }
   0x9   :  { %s2345_s11 = smov 0   ;;  %s2347_s12 = smov 0  }
   0xa   :  { %s2349_s13 = smov 0   ;;  %s2351_s14 = smov 0  }
   0xb   :  { %s2353_s15 = smov 0  }
   0xc LB: > { %2826 = sst [smem:[#allocation18_spill]] %s2235_s30  ;;  %s2377_s16 = sadd.s32 4294967295, %s2259_s15   ;;  %s2259_s15 = sphi %s2353_s15, %s2868_s15   ;;  %s2255_s14 = sphi %s2351_s14, %s2872_s14   ;;  %s2251_s13 = sphi %s2349_s13, %s2876_s13   ;;  %s2247_s12 = sphi %s2347_s12, %s2875_s12   ;;  %s2243_s11 = sphi %s2345_s11, %s2870_s11   ;;  %s2239_s10 = sphi %s2343_s10, %s2874_s10   ;;  %s2235_s30 = sphi %s2341_s30, %s2873_s30  }
   0xd   : > { %2827 = sst [smem:[#allocation19_spill]] %s2243_s11  ;;  %s1650_s17 = sadd.s32 4294967294, %s2259_s15  }
   0xe   : > { %2828 = sst [smem:[#allocation20_spill]] %s2247_s12  ;;  %s2381_s18 = sadd.s32 1, %s2259_s15  }
   0xf   : > { %2829 = sst [smem:[#allocation21_spill]] %s2255_s14  ;;  %s215_s19 = sadd.s32 1, %s2255_s14 }
  0x10   : > { %2830 = sst [smem:[#allocation22_spill]] %s2259_s15  ;;  %s212_s20 = ssub.s32 %s2259_s15, %s2381_s18 }
  0x11   : > { %2831 = sst [smem:[#allocation23_spill]] %s2381_s18  ;;  %p225_p0 = scmp.ne.s32.totalorder %s2255_s14, %s2251_s13 }
  0x12   : > { %p213_p1 = scmp.eq.s32.totalorder %s212_s20, 0  ;;  %p226_p2 = scmp.eq.s32.totalorder %s2377_s16, 2 }
  0x13   : > { %p231_p3 = scmp.ne.s32.totalorder %s2251_s13, %s2247_s12  ;;  %p2391_p4 = scmp.eq.s32.totalorder %s1650_s17, 2 }
  0x14   : > { %s2396_s22 = scalar_select %p213_p1, %s2255_s14, %s215_s19  }
  0x15   : > { %p2400_p5 = por %p226_p2, %p225_p0  ;;  %p2406_p6 = por %p2391_p4, %p231_p3 }
  0x16   : > { %2833 = sst [smem:[#allocation24_spill]] %s2396_s22  ;;  %s238_s25 = ssub.s32 2, %s2259_s15 }
  0x17   : > { %s2834_s23 = scalar_select %p2400_p5, 1, 0 }
  0x18   : > { %s2835_s24 = scalar_select %p2406_p6, 1, 0 }
  0x19   : > { %s239_s26 = ssub.s32 2, %s2381_s18  ;;  %s243_s28 = sadd.s32 1, %s2243_s11 }
  0x1a   : > { %2836 = sst [smem:[#allocation25_spill]] %s2835_s24  ;;  %s240_s27 = ssub.s32 %s238_s25, %s239_s26 }
  0x1b   : > { %p241_p7 = scmp.eq.s32.totalorder %s240_s27, 0  ;;  %p253_p8 = scmp.ne.s32.totalorder %s2243_s11, %s2239_s10 }
  0x1c   : > { %p259_p9 = scmp.ne.s32.totalorder %s2239_s10, %s2235_s30  ;;  %p1651_p10 = scmp.ge.s32.totalorder %s2259_s15, 1 }
  0x1d   : > { %s2419_s29 = scalar_select %p241_p7, %s2243_s11, %s243_s28  }
  0x1e   : > { %p2423_p11 = por %p253_p8, %p226_p2  ;;  %p2429_p12 = por %p259_p9, %p2391_p4 }
  0x1f   : > { %2837 = sst [smem:[#allocation26_spill]] %s2419_s29  ;;  %p267_p13 = scmp.lt.s32.totalorder %s2259_s15, 4 }
  0x20   : > { %s2838_s17 = scalar_select %p2423_p11, 1, 0 }
  0x21   : > { %s2839_s19 = scalar_select %p2429_p12, 1, 0 }
  0x22   : > { %p2813_p1 = scmp.eq.s32.totalorder %s2377_s16, 0  ;;  %p2436_p3 = pnand %p1651_p10, %p267_p13 }
  0x23   : > { %2840 = sst [smem:[#allocation27_spill]] %s2839_s19  ;;  %s2281_s25 = smov [#allocation6]  }
  0x24   : > { %s2841_s20 = scalar_select %p2436_p3, 1, 0 }
  0x25   : > { %s285_s26 = sshll.u32 %s2281_s25, 4  ;;  %p1794_p2 = pneg %p2436_p3  ;;  %s286_s26 = int_to_ptr.vmem [resolvable:$true] %s285_s26 }
  0x26   : > { %s2282_s27 = smov [#allocation9]   ;;  %s2843_s4 = sld [smem:[#allocation28_spill]] }
  0x27   : > { %p2444_p7 = pnand %p2813_p1, %p1794_p2  ;;  %s298_s28 = sshll.u32 %s2282_s27, 4  ;;  %s2448_s28 = int_to_ptr.vmem [resolvable:$true] %s298_s28 }
  0x29   : > { %p2059_p8 = pneg %p2444_p7 }
  0x2c   : > { %s2057_s29 = scalar_lea.hbm %s2843_s4, 4096 }
  0x2d   : > { %p2058_p4 = scmp.ne.s32.totalorder %s2843_s4, %s2057_s29  ;;  %p2064_p13 = scmp.lt.u32.totalorder %s2057_s29, %s2843_s4 }
  0x2f   : > { %p2060_p9 = pnand %p2059_p8, %p2058_p4 }
  0x31   : > { %p2061_p10 = pneg %p2060_p9 }
  0x33   : > { %p2066_p2 = pnand %p2064_p13, %p2061_p10 }
  0x35   : > { %2069 = shalt.err (!%p2066_p2)
}
  0x36   : > { %s2070_s27 = scalar_lea.vmem %s286_s26, 4096  ;;  %p2078_p6 = scmp.lt.s32.totalorder %s286_s26, %s286_s26 }
  0x37   : > { %p2071_p0 = scmp.ne.s32.totalorder %s286_s26, %s2070_s27  ;;  %p2079_p11 = scmp.lt.s32.totalorder %s2070_s27, %s2070_s27 }
  0x39   : > { %p2073_p1 = pnand %p2071_p0, %p2059_p8  ;;  %p2080_p5 = por %p2079_p11, %p2078_p6 }
  0x3b   : > { %p2074_p12 = pneg %p2073_p1 }
  0x3d   : > { %p2081_p3 = pnand %p2080_p5, %p2074_p12 }
  0x3f   : > { %2084 = shalt.err (!%p2081_p3)
}
  0x40   : > { %s2283_s11 = smov 256   ;;  %s2284_s14 = smov 16  }
  0x41   : > { %1797 = dma.hbm_to_vmem [thread:$0]  (!%p2444_p7), %s2843_s4, 4096, %s286_s26, [#allocation7], %s2283_s11, %s2283_s11, %s2284_s14  }
  0x42   : > { %s2844_s5 = sld [smem:[#allocation29_spill]] }
  0x48   : > { %s2085_s25 = scalar_lea.hbm %s2844_s5, 4096 }
  0x49   : > { %p2086_p0 = scmp.ne.s32.totalorder %s2844_s5, %s2085_s25  ;;  %p2092_p11 = scmp.lt.u32.totalorder %s2085_s25, %s2844_s5 }
  0x4b   : > { %p2088_p5 = pnand %p2086_p0, %p2059_p8 }
  0x4d   : > { %p2089_p6 = pneg %p2088_p5 }
  0x4f   : > { %p2094_p12 = pnand %p2092_p11, %p2089_p6 }
  0x51   : > { %2097 = shalt.err (!%p2094_p12)
}
  0x52   : > { %s2098_s26 = scalar_lea.vmem %s2448_s28, 4096  ;;  %p2106_p9 = scmp.lt.s32.totalorder %s2448_s28, %s2448_s28 }
  0x53   : > { %p2099_p1 = scmp.ne.s32.totalorder %s2448_s28, %s2098_s26  ;;  %p2107_p10 = scmp.lt.s32.totalorder %s2098_s26, %s2098_s26 }
  0x55   : > { %p2101_p3 = pnand %p2099_p1, %p2059_p8  ;;  %p2108_p13 = por %p2107_p10, %p2106_p9 }
  0x57   : > { %p2102_p4 = pneg %p2101_p3 }
  0x59   : > { %p2109_p2 = pnand %p2108_p13, %p2102_p4 }
  0x5b   : > { %2112 = shalt.err (!%p2109_p2)
}
  0x5c   : > { %1800 = dma.hbm_to_vmem [thread:$0]  (!%p2444_p7), %s2844_s5, 4096, %s2448_s28, [#allocation10], %s2283_s11, %s2283_s11, %s2284_s14  }
  0x5d   : > { %p2845_p0 = scmp.ne.s32.totalorder %s2841_s20, 0 }
  0x5e   : > { %p2846_p5 = scmp.eq.s32.totalorder (!%p2845_p0), %s2377_s16, 0 }
  0x5f   : > { %340 = sbr.rel (%p2845_p0) target bundleno = 732 (0x2dc), region = 52 }
  0x66   : > { %2218 = dma.done.wait (%p2846_p5), [#allocation7], 4096   ;;  %p2847_p8 = pmov %p2846_p5 }
  0x67   : > { %p2848_p6 = pmov %p2846_p5 }
  0x68   : > { %2220 = vsyncadd (%p2847_p8), [#allocation7], 4294963200 }
  0x69   : > { %2222 = dma.done.wait (%p2848_p6), [#allocation10], 4096   ;;  %p2849_p11 = pmov %p2846_p5 }
  0x6a   : > { %s2821_s24 = sand.u32 1, %s2251_s13   ;;  %s2820_s20 = sand.u32 1, %s2239_s10  }
  0x6b   : > { %2224 = vsyncadd (%p2849_p11), [#allocation10], 4294963200  ;;  %s2511_s21 = sshll.u32 %s2821_s24, 4  ;;  %s2515_s28 = sshll.u32 %s2820_s20, 4 }
  0x6c   : > { %s1660_s11 = sshll.u32 %s2377_s16, 2  ;;  %s2822_s14 = ssub.s32 2, %s2377_s16 }
  0x6d   : > { %p392_p7 = scmp.lt.s32.totalorder %s1660_s11, 11  ;;  %s2521_s18 = sshll.u32 %s2822_s14, 2 }
  0x6e   : > { %p399_p12 = scmp.lt.s32.totalorder %s2521_s18, 11  ;;  %s383_s24 = scalar_lea.vmem [#allocation11], %s2511_s21 }
  0x6f   : > { %s2878_s11 = smov (!%p392_p7, %s1660_s11), 11  ;;  %s390_s14 = scalar_lea.vmem [#allocation12], %s2515_s28 }
  0x70   : > { %s400_s22 = scalar_select %p399_p12, %s2521_s18, 11 }
  0x71   : > { %s1661_s29 = sshll.u32 %s2878_s11, 2  ;;  %p2850_p1 = scmp.ne.s32.totalorder %s2377_s16, 0 }
  0x72   : > { %s2528_s27 = scalar_lea.vmem %s2798_s0, %s1661_s29  ;;  %s1663_s26 = sshll.u32 %s400_s22, 2  ;;  %v413_v0 = vld [vmem:[%s2804_s6] sm:$0xff] (!%p2850_p1)  ;;  %v414_v1 = vld [vmem:[%s2804_s6 + $0x8] sm:$0xff] (!%p2850_p1) }
  0x73   : > { %s2533_s20 = scalar_lea.vmem %s2799_s1, %s1663_s26  ;;  %412 = sbr.rel (%p2850_p1) target bundleno = 122 (0x7a), region = 64  ;;  %v417_v2 = vld [vmem:[%s2805_s7] sm:$0xff] (!%p2850_p1)  ;;  %415 = vst [vmem:[#allocation4] sm:$0xff] (!%p2850_p1), %v413_v0  ;;  %416 = vst [vmem:[#allocation4 + $0x8] sm:$0xff] (!%p2850_p1), %v414_v1  ;;  %v418_v3 = vld [vmem:[%s2805_s7 + $0x8] sm:$0xff] (!%p2850_p1) }
  0x74   : > { %419 = vst [vmem:[#allocation5] sm:$0xff] (!%p2850_p1), %v417_v2  ;;  %420 = vst [vmem:[#allocation5 + $0x8] sm:$0xff] (!%p2850_p1), %v418_v3 }
  0x7a PF: > { %v1917_v4 = vld [vmem:[%s2800_s2 + $0x4] ss:$16 sps:$4 sm:$0xff]   ;;  %v1919_v5 = vld [vmem:[%s2800_s2 + $0xc] ss:$16 sps:$4 sm:$0xff]   ;;  %v2285_v6 = vmov 0   ;;  %vm478_vm0 = vcmask 1043456  }
  0x7b   : > { %523 = vmatprep.mubr.bf16.mxu0 %v2285_v6  ;;  %576 = vmatprep.mubr.bf16.mxu1 %v2285_v6  ;;  %v1921_v7 = vld [vmem:[%s2800_s2] ss:$16 sps:$4 sm:$0xff]   ;;  %v1922_v8 = vld [vmem:[%s2800_s2 + $0x8] ss:$16 sps:$4 sm:$0xff]   ;;  %v1930_v17 = vld [vmem:[%s2801_s3 + $0x4] ss:$16 sps:$4 sm:$0xff]  }
  0x7c   : > { %491 = vmatprep.subr.bf16.mxu0 %v1917_v4  ;;  %v429_v9 = vld [vmem:[%s2800_s2 + $0x20] sm:$0xff]  ;;  %544 = vmatprep.subr.bf16.mxu1 %v1919_v5  ;;  %v430_v11 = vld [vmem:[%s2800_s2 + $0x28] sm:$0xff]  ;;  %vm471_vm1 = vcmask 195584   ;;  %v2607_v33 = vld [vmem:[#allocation4] sm:$0xff]  }
  0x7d   : > { %v1672_v10 = vcombine.high %v429_v9, %v429_v9  ;;  %v1671_v12 = vcombine.low %v429_v9, %v429_v9  ;;  %492 = vmatpush1.bf16.msra.mxu0 %v1921_v7  ;;  %545 = vmatpush1.bf16.msra.mxu1 %v1922_v8  ;;  %v1674_v13 = vcombine.high %v430_v11, %v430_v11  ;;  %v1927_v16 = vld [vmem:[%s2528_s27] sm:$0xff]   ;;  %v1933_v20 = vld [vmem:[%s2801_s3 + $0xc] ss:$16 sps:$4 sm:$0xff]   ;;  %v1931_v21 = vld [vmem:[%s2801_s3 + $0x8] ss:$16 sps:$4 sm:$0xff]  }
  0x7e   : > { %v1673_v14 = vcombine.low %v430_v11, %v430_v11  ;;  %v1928_v19 = vld [vmem:[%s2801_s3] ss:$16 sps:$4 sm:$0xff]   ;;  %v622_v23 = vld [vmem:[%s2801_s3 + $0x28] sm:$0xff]  ;;  %v2611_v35 = vld [vmem:[#allocation4 + $0x8] sm:$0xff]  }
  0x7f   : > { %1675 = vmatprep.subr.msk.bf16.mxu0 %vm478_vm0, %v1672_v10  ;;  %v480_v15 = vsel %vm478_vm0, %v1671_v12, 0  ;;  %1678 = vmatprep.subr.msk.bf16.mxu1 %vm478_vm0, %v1674_v13  ;;  %v621_v22 = vld [vmem:[%s2801_s3 + $0x20] sm:$0xff]  ;;  %v1690_v26 = vcombine.high %v622_v23, %v622_v23  ;;  %v1689_v27 = vcombine.low %v622_v23, %v622_v23  ;;  %v1934_v30 = vld [vmem:[%s2528_s27 + $0x8] sm:$0xff]  }
  0x80   : > { %v486_v18 = vsel %vm478_vm0, %v1673_v14, 0  ;;  %v1687_v24 = vcombine.low %v621_v22, %v621_v22  ;;  %v1688_v25 = vcombine.high %v621_v22, %v621_v22  ;;  %v1939_v31 = vld [vmem:[%s2533_s20] sm:$0xff]   ;;  %v1940_v32 = vld [vmem:[%s2533_s20 + $0x8] sm:$0xff]   ;;  %s2627_s20 = smov 0  }
  0x81   : > { %494 = vmatpush1.bf16.msra.mxu0 %v480_v15  ;;  %547 = vmatpush1.bf16.msra.mxu1 %v486_v18  ;;  %v676_v29 = vsel %vm478_vm0, %v1689_v27, 0  ;;  %v2609_v34 = vld [vmem:[#allocation5] sm:$0xff]   ;;  %v2613_v36 = vld [vmem:[#allocation5 + $0x8] sm:$0xff]  }
  0x82   : > { %681 = vmatprep.subr.bf16.mxu0 %v1930_v17  ;;  %734 = vmatprep.subr.bf16.mxu1 %v1933_v20  ;;  %v670_v28 = vsel %vm478_vm0, %v1687_v24, 0 }
  0x84   : > { %1676 = vmatmul.mubr.msk.bf16.vlgmr.msra.gmra.mrb[0].mxu0 %vm471_vm1, %v1927_v16  ;;  %1679 = vmatmul.mubr.msk.bf16.vlgmr.msra.gmra.mrb[0].mxu1 %vm471_vm1, %v1927_v16 }
  0x85   : > { %682 = vmatpush1.bf16.msra.mxu0 %v1928_v19  ;;  %735 = vmatpush1.bf16.msra.mxu1 %v1931_v21 }
  0x86   : > { %533 = vmatprep.mubr.bf16.mxu0 %v2285_v6  ;;  %586 = vmatprep.mubr.bf16.mxu1 %v2285_v6 }
  0x87   : > { %1691 = vmatprep.subr.msk.bf16.mxu0 %vm478_vm0, %v1688_v25  ;;  %1694 = vmatprep.subr.msk.bf16.mxu1 %vm478_vm0, %v1690_v26 }
  0x89   : > { %684 = vmatpush1.bf16.msra.mxu0 %v670_v28  ;;  %737 = vmatpush1.bf16.msra.mxu1 %v676_v29 }
  0x8c   : > { %1677 = vmatmul.mubr.msk.bf16.gmra.mrb[4].mxu0 %vm471_vm1, %v1934_v30  ;;  %1680 = vmatmul.mubr.msk.bf16.gmra.mrb[4].mxu1 %vm471_vm1, %v1934_v30 }
  0x8d   : > { %713 = vmatprep.mubr.bf16.mxu0 %v2285_v6  ;;  %766 = vmatprep.mubr.bf16.mxu1 %v2285_v6 }
  0x94   : > { %1692 = vmatmul.mubr.msk.bf16.vlgmr.msra.gmra.mrb[8].mxu0 %vm471_vm1, %v1939_v31  ;;  %1695 = vmatmul.mubr.msk.bf16.vlgmr.msra.gmra.mrb[8].mxu1 %vm471_vm1, %v1939_v31 }
  0x95   : > { %723 = vmatprep.mubr.bf16.mxu0 %v2285_v6  ;;  %776 = vmatprep.mubr.bf16.mxu1 %v2285_v6 }
  0x9c   : > { %1693 = vmatmul.mubr.msk.bf16.gmra.mrb[12].mxu0 %vm471_vm1, %v1940_v32  ;;  %1696 = vmatmul.mubr.msk.bf16.gmra.mrb[12].mxu1 %vm471_vm1, %v1940_v32 }
 0x157   : > { %v525_v37 = vpop.f32.mrb[0].mxu0  ;;  %v578_v38 = vpop.f32.mrb[0].mxu1 }
 0x158   : > { %597 = vst [vmem:[#allocation2] sm:$0xff] %v525_v37  ;;  %599 = vst [vmem:[#allocation2 + $0x10] sm:$0xff] %v578_v38  ;;  %v527_v39 = vpop.f32.mrb[1].mxu0  ;;  %v580_v40 = vpop.f32.mrb[1].mxu1 }
 0x159   : > { %598 = vst [vmem:[#allocation2 + $0x8] sm:$0xff] %v527_v39  ;;  %600 = vst [vmem:[#allocation2 + $0x18] sm:$0xff] %v580_v40  ;;  %v529_v41 = vpop.f32.mrb[2].mxu0  ;;  %v582_v42 = vpop.f32.mrb[2].mxu1 }
 0x15a   : > { %601 = vst [vmem:[#allocation2 + $0x20] sm:$0xff] %v529_v41  ;;  %603 = vst [vmem:[#allocation2 + $0x30] sm:$0xff] %v582_v42  ;;  %v531_v43 = vpop.f32.mrb[3].mxu0  ;;  %v584_v44 = vpop.f32.mrb[3].mxu1 }
 0x15b   : > { %602 = vst [vmem:[#allocation2 + $0x28] sm:$0xff] %v531_v43  ;;  %604 = vst [vmem:[#allocation2 + $0x38] sm:$0xff] %v584_v44 }
 0x15f   : > { %v535_v45 = vpop.f32.mrb[4].mxu0  ;;  %v588_v46 = vpop.f32.mrb[4].mxu1 }
 0x160   : > { %605 = vst [vmem:[#allocation2 + $0x40] sm:$0xff] %v535_v45  ;;  %607 = vst [vmem:[#allocation2 + $0x50] sm:$0xff] %v588_v46  ;;  %v537_v47 = vpop.f32.mrb[5].mxu0  ;;  %v590_v48 = vpop.f32.mrb[5].mxu1 }
 0x161   : > { %606 = vst [vmem:[#allocation2 + $0x48] sm:$0xff] %v537_v47  ;;  %608 = vst [vmem:[#allocation2 + $0x58] sm:$0xff] %v590_v48  ;;  %v539_v49 = vpop.f32.mrb[6].mxu0  ;;  %v592_v50 = vpop.f32.mrb[6].mxu1 }
 0x162   : > { %609 = vst [vmem:[#allocation2 + $0x60] sm:$0xff] %v539_v49  ;;  %611 = vst [vmem:[#allocation2 + $0x70] sm:$0xff] %v592_v50  ;;  %v541_v51 = vpop.f32.mrb[7].mxu0  ;;  %v594_v52 = vpop.f32.mrb[7].mxu1 }
 0x163   : > { %610 = vst [vmem:[#allocation2 + $0x68] sm:$0xff] %v541_v51  ;;  %612 = vst [vmem:[#allocation2 + $0x78] sm:$0xff] %v594_v52 }
 0x167   : > { %v715_v53 = vpop.f32.mrb[8].mxu0  ;;  %v768_v54 = vpop.f32.mrb[8].mxu1 }
 0x168   : > { %787 = vst [vmem:[#allocation3] sm:$0xff] %v715_v53  ;;  %789 = vst [vmem:[#allocation3 + $0x10] sm:$0xff] %v768_v54  ;;  %v717_v55 = vpop.f32.mrb[9].mxu0  ;;  %v770_v56 = vpop.f32.mrb[9].mxu1 }
 0x169   : > { %788 = vst [vmem:[#allocation3 + $0x8] sm:$0xff] %v717_v55  ;;  %790 = vst [vmem:[#allocation3 + $0x18] sm:$0xff] %v770_v56  ;;  %v719_v57 = vpop.f32.mrb[10].mxu0  ;;  %v772_v58 = vpop.f32.mrb[10].mxu1 }
 0x16a   : > { %791 = vst [vmem:[#allocation3 + $0x20] sm:$0xff] %v719_v57  ;;  %793 = vst [vmem:[#allocation3 + $0x30] sm:$0xff] %v772_v58  ;;  %v721_v59 = vpop.f32.mrb[11].mxu0  ;;  %v774_v60 = vpop.f32.mrb[11].mxu1 }
 0x16b   : > { %792 = vst [vmem:[#allocation3 + $0x28] sm:$0xff] %v721_v59  ;;  %794 = vst [vmem:[#allocation3 + $0x38] sm:$0xff] %v774_v60 }
 0x16f   : > { %v725_v61 = vpop.f32.mrb[12].mxu0  ;;  %v778_v62 = vpop.f32.mrb[12].mxu1 }
 0x170   : > { %795 = vst [vmem:[#allocation3 + $0x40] sm:$0xff] %v725_v61  ;;  %797 = vst [vmem:[#allocation3 + $0x50] sm:$0xff] %v778_v62  ;;  %v727_v63 = vpop.f32.mrb[13].mxu0  ;;  %v780_v0 = vpop.f32.mrb[13].mxu1 }
 0x171   : > { %796 = vst [vmem:[#allocation3 + $0x48] sm:$0xff] %v727_v63  ;;  %798 = vst [vmem:[#allocation3 + $0x58] sm:$0xff] %v780_v0  ;;  %v729_v1 = vpop.f32.mrb[14].mxu0  ;;  %v782_v2 = vpop.f32.mrb[14].mxu1 }
 0x172   : > { %799 = vst [vmem:[#allocation3 + $0x60] sm:$0xff] %v729_v1  ;;  %801 = vst [vmem:[#allocation3 + $0x70] sm:$0xff] %v782_v2  ;;  %v731_v3 = vpop.f32.mrb[15].mxu0  ;;  %v784_v4 = vpop.f32.mrb[15].mxu1 }
 0x173   : > { %800 = vst [vmem:[#allocation3 + $0x68] sm:$0xff] %v731_v3  ;;  %802 = vst [vmem:[#allocation3 + $0x78] sm:$0xff] %v784_v4 }
 0x174 LB: >> { %v1941_v5 = vld [vmem:[#allocation6 + $0x4] ss:$16 sps:$4 sm:$0xff]   ;;  %v1943_v6 = vld [vmem:[#allocation6] ss:$16 sps:$4 sm:$0xff]   ;;  %v2286_v7 = vmov 0   ;;  %v831_v42 = vpack.c.bf16 %v2275_v33, %v2275_v33  ;;  %s1697_s27 = sshll.u32 %s2279_s20, 3  ;;  %s2279_s20 = sphi %s2627_s20, %s814_s20   ;;  %v2275_v33 = vphi %v2607_v33, %v2855_v33   ;;  %v2271_v34 = vphi %v2609_v34, %v2854_v34   ;;  %v2267_v35 = vphi %v2611_v35, %v2853_v35   ;;  %v2263_v36 = vphi %v2613_v36, %v2852_v36  }
 0x175   : >> { %1056 = vmatprep.mubr.bf16.mxu0 %v2286_v7  ;;  %1097 = vmatprep.mubr.bf16.mxu1 %v2286_v7  ;;  %v1944_v8 = vld [vmem:[#allocation6 + $0x24] ss:$16 sps:$4 sm:$0xff]   ;;  %v1946_v9 = vld [vmem:[#allocation6 + $0xc] ss:$16 sps:$4 sm:$0xff]   ;;  %v1948_v10 = vld [vmem:[#allocation6 + $0x20] ss:$16 sps:$4 sm:$0xff]  }
 0x176   : >> { %1024 = vmatprep.subr.bf16.mxu0 %v1941_v5  ;;  %v1949_v11 = vld [vmem:[#allocation6 + $0x8] ss:$16 sps:$4 sm:$0xff]   ;;  %v1950_v12 = vld [vmem:[#allocation6 + $0x44] ss:$16 sps:$4 sm:$0xff]   ;;  %1065 = vmatprep.subr.bf16.mxu1 %v1946_v9  ;;  %v1952_v13 = vld [vmem:[#allocation6 + $0x2c] ss:$16 sps:$4 sm:$0xff]   ;;  %v1119_v9 = vpack.c.bf16 %v2267_v35, %v2267_v35 }
 0x177   : >> { %1025 = vmatpush1.bf16.msra.mxu0 %v1943_v6  ;;  %1066 = vmatpush1.bf16.msra.mxu1 %v1949_v11  ;;  %v1955_v14 = vld [vmem:[#allocation6 + $0x28] ss:$16 sps:$4 sm:$0xff]   ;;  %v1954_v15 = vld [vmem:[#allocation6 + $0x40] ss:$16 sps:$4 sm:$0xff]   ;;  %v1956_v16 = vld [vmem:[#allocation6 + $0x64] ss:$16 sps:$4 sm:$0xff]  }
 0x178   : >> { %1026 = vmatprep.subr.bf16.mxu0 %v1944_v8  ;;  %1067 = vmatprep.subr.bf16.mxu1 %v1952_v13  ;;  %v1958_v17 = vld [vmem:[#allocation6 + $0x4c] ss:$16 sps:$4 sm:$0xff]   ;;  %v1961_v18 = vld [vmem:[#allocation6 + $0x48] ss:$16 sps:$4 sm:$0xff]   ;;  %v1960_v19 = vld [vmem:[#allocation6 + $0x60] ss:$16 sps:$4 sm:$0xff]  }
 0x179   : >> { %v1964_v20 = vld [vmem:[#allocation6 + $0x6c] ss:$16 sps:$4 sm:$0xff]   ;;  %v1962_v21 = vld [vmem:[#allocation6 + $0x84] ss:$16 sps:$4 sm:$0xff]   ;;  %v1966_v22 = vld [vmem:[#allocation6 + $0x80] ss:$16 sps:$4 sm:$0xff]  }
 0x17a   : >> { %v1967_v23 = vld [vmem:[#allocation6 + $0x68] ss:$16 sps:$4 sm:$0xff]   ;;  %v1970_v24 = vld [vmem:[#allocation6 + $0x8c] ss:$16 sps:$4 sm:$0xff]   ;;  %v1968_v25 = vld [vmem:[#allocation6 + $0xa4] ss:$16 sps:$4 sm:$0xff]  }
 0x17b   : >> { %1027 = vmatpush1.bf16.msra.mxu0 %v1948_v10  ;;  %1068 = vmatpush1.bf16.msra.mxu1 %v1955_v14  ;;  %v1973_v26 = vld [vmem:[#allocation6 + $0x88] ss:$16 sps:$4 sm:$0xff]   ;;  %v1972_v27 = vld [vmem:[#allocation6 + $0xa0] ss:$16 sps:$4 sm:$0xff]   ;;  %v1976_v28 = vld [vmem:[#allocation6 + $0xac] ss:$16 sps:$4 sm:$0xff]  }
 0x17c   : >> { %1028 = vmatprep.subr.bf16.mxu0 %v1950_v12  ;;  %1069 = vmatprep.subr.bf16.mxu1 %v1958_v17  ;;  %v1974_v29 = vld [vmem:[#allocation6 + $0xc4] ss:$16 sps:$4 sm:$0xff]   ;;  %v1979_v30 = vld [vmem:[#allocation6 + $0xa8] ss:$16 sps:$4 sm:$0xff]   ;;  %v1978_v31 = vld [vmem:[#allocation6 + $0xc0] ss:$16 sps:$4 sm:$0xff]  }
 0x17d   : >> { %v1982_v32 = vld [vmem:[#allocation6 + $0xcc] ss:$16 sps:$4 sm:$0xff]   ;;  %v1980_v37 = vld [vmem:[#allocation6 + $0xe4] ss:$16 sps:$4 sm:$0xff]   ;;  %v1985_v38 = vld [vmem:[#allocation6 + $0xc8] ss:$16 sps:$4 sm:$0xff]  }
 0x17e   : >> { %v1984_v39 = vld [vmem:[#allocation6 + $0xe0] ss:$16 sps:$4 sm:$0xff]   ;;  %v1986_v40 = vld [vmem:[#allocation6 + $0xec] ss:$16 sps:$4 sm:$0xff]   ;;  %v1990_v41 = vld [vmem:[#allocation9 + $0x4] ss:$16 sps:$4 sm:$0xff]  }
 0x17f   : >> { %1029 = vmatpush1.bf16.msra.mxu0 %v1954_v15  ;;  %1070 = vmatpush1.bf16.msra.mxu1 %v1961_v18  ;;  %v1991_v43 = vld [vmem:[#allocation6 + $0xe8] ss:$16 sps:$4 sm:$0xff]   ;;  %v1988_v44 = vld [vmem:[#allocation9] ss:$16 sps:$4 sm:$0xff]   ;;  %v1997_v45 = vld [vmem:[#allocation9 + $0xc] ss:$16 sps:$4 sm:$0xff]  }
 0x180   : >> { %1030 = vmatprep.subr.bf16.mxu0 %v1956_v16  ;;  %1071 = vmatprep.subr.bf16.mxu1 %v1964_v20  ;;  %v1994_v46 = vld [vmem:[#allocation9 + $0x24] ss:$16 sps:$4 sm:$0xff]   ;;  %v1995_v47 = vld [vmem:[#allocation9 + $0x8] ss:$16 sps:$4 sm:$0xff]   ;;  %v1992_v48 = vld [vmem:[#allocation9 + $0x20] ss:$16 sps:$4 sm:$0xff]  }
 0x181   : >> { %v2003_v49 = vld [vmem:[#allocation9 + $0x2c] ss:$16 sps:$4 sm:$0xff]   ;;  %v2000_v50 = vld [vmem:[#allocation9 + $0x44] ss:$16 sps:$4 sm:$0xff]   ;;  %v2001_v33 = vld [vmem:[#allocation9 + $0x28] ss:$16 sps:$4 sm:$0xff]  }
 0x182   : >> { %v1998_v51 = vld [vmem:[#allocation9 + $0x40] ss:$16 sps:$4 sm:$0xff]   ;;  %v2009_v52 = vld [vmem:[#allocation9 + $0x4c] ss:$16 sps:$4 sm:$0xff]   ;;  %v2006_v53 = vld [vmem:[#allocation9 + $0x64] ss:$16 sps:$4 sm:$0xff]  }
 0x183   : >> { %1031 = vmatpush1.bf16.msra.mxu0 %v1960_v19  ;;  %1072 = vmatpush1.bf16.msra.mxu1 %v1967_v23  ;;  %v2007_v54 = vld [vmem:[#allocation9 + $0x48] ss:$16 sps:$4 sm:$0xff]   ;;  %v2004_v55 = vld [vmem:[#allocation9 + $0x60] ss:$16 sps:$4 sm:$0xff]   ;;  %v2015_v56 = vld [vmem:[#allocation9 + $0x6c] ss:$16 sps:$4 sm:$0xff]  }
 0x184   : >> { %1032 = vmatprep.subr.bf16.mxu0 %v1962_v21  ;;  %1073 = vmatprep.subr.bf16.mxu1 %v1970_v24  ;;  %v2012_v57 = vld [vmem:[#allocation9 + $0x84] ss:$16 sps:$4 sm:$0xff]   ;;  %v2013_v58 = vld [vmem:[#allocation9 + $0x68] ss:$16 sps:$4 sm:$0xff]   ;;  %v2010_v59 = vld [vmem:[#allocation9 + $0x80] ss:$16 sps:$4 sm:$0xff]  }
 0x185   : >> { %v2021_v60 = vld [vmem:[#allocation9 + $0x8c] ss:$16 sps:$4 sm:$0xff]   ;;  %v2018_v61 = vld [vmem:[#allocation9 + $0xa4] ss:$16 sps:$4 sm:$0xff]   ;;  %v2019_v62 = vld [vmem:[#allocation9 + $0x88] ss:$16 sps:$4 sm:$0xff]  }
 0x186   : >> { %v2016_v63 = vld [vmem:[#allocation9 + $0xa0] ss:$16 sps:$4 sm:$0xff]   ;;  %v2027_v0 = vld [vmem:[#allocation9 + $0xac] ss:$16 sps:$4 sm:$0xff]   ;;  %v2024_v1 = vld [vmem:[#allocation9 + $0xc4] ss:$16 sps:$4 sm:$0xff]  }
 0x187   : >> { %1033 = vmatpush1.bf16.msra.mxu0 %v1966_v22  ;;  %1074 = vmatpush1.bf16.msra.mxu1 %v1973_v26  ;;  %v2025_v2 = vld [vmem:[#allocation9 + $0xa8] ss:$16 sps:$4 sm:$0xff]   ;;  %v2022_v3 = vld [vmem:[#allocation9 + $0xc0] ss:$16 sps:$4 sm:$0xff]   ;;  %v2033_v4 = vld [vmem:[#allocation9 + $0xcc] ss:$16 sps:$4 sm:$0xff]  }
 0x188   : >> { %1034 = vmatprep.subr.bf16.mxu0 %v1968_v25  ;;  %1075 = vmatprep.subr.bf16.mxu1 %v1976_v28  ;;  %v2030_v5 = vld [vmem:[#allocation9 + $0xe4] ss:$16 sps:$4 sm:$0xff]   ;;  %v2031_v6 = vld [vmem:[#allocation9 + $0xc8] ss:$16 sps:$4 sm:$0xff]   ;;  %v2036_v8 = vld [vmem:[#allocation9 + $0xec] ss:$16 sps:$4 sm:$0xff]  }
 0x189   : >> { %v2034_v10 = vld [vmem:[#allocation9 + $0xe8] ss:$16 sps:$4 sm:$0xff]   ;;  %s2653_s5 = sshra.s32 %s1697_s27, 3  ;;  %s819_s12 = ssub.s32 3, %s2279_s20 }
 0x18a   : >> { %s1778_s15 = sshll.u32 %s2653_s5, 5  ;;  %s2657_s11 = sshll.u32 %s819_s12, 3 }
 0x18b   : >> { %1035 = vmatpush1.bf16.msra.mxu0 %v1972_v27  ;;  %1076 = vmatpush1.bf16.msra.mxu1 %v1979_v30  ;;  %s826_s30 = scalar_lea.vmem [#allocation2], %s1778_s15  ;;  %s1110_s29 = sshra.s32 %s2657_s11, 3 }
 0x18c   : >> { %1036 = vmatprep.subr.bf16.mxu0 %v1974_v29  ;;  %1077 = vmatprep.subr.bf16.mxu1 %v1982_v32  ;;  %v827_v11 = vld [vmem:[%s826_s30] sm:$0xff]  ;;  %v828_v12 = vld [vmem:[%s826_s30 + $0x8] sm:$0xff]  ;;  %v829_v16 = vld [vmem:[%s826_s30 + $0x10] sm:$0xff]  ;;  %s1779_s22 = sshll.u32 %s1110_s29, 5  ;;  %s1444_s25 = sadd.s32 %s2521_s18, %s819_s12 }
 0x18d   : >> { %v830_v26 = vld [vmem:[%s826_s30 + $0x18] sm:$0xff]  ;;  %s1114_s19 = scalar_lea.vmem [#allocation3], %s1779_s22  ;;  %s1767_s26 = sshll.u32 %s2653_s5, 2 }
 0x18e   : >> { %p1445_p3 = scmp.lt.s32.totalorder %s1444_s25, 10  ;;  %s1436_s4 = scalar_lea.vmem %s383_s24, %s1767_s26 [#allocation11] }
 0x18f   : >> { %1037 = vmatpush1.bf16.msra.mxu0 %v1978_v31  ;;  %1078 = vmatpush1.bf16.msra.mxu1 %v1985_v38  ;;  %s1768_s30 = sshll.u32 %s1110_s29, 2  ;;  %s814_s20 = sadd.s32 1, %s2279_s20  }
 0x190   : >> { %1038 = vmatprep.subr.bf16.mxu0 %v1980_v37  ;;  %1079 = vmatprep.subr.bf16.mxu1 %v1986_v40  ;;  %s1446_s27 = scalar_select %p1445_p3, 1, 0 }
 0x191   : >> { %s1440_s12 = scalar_lea.vmem %s390_s14, %s1768_s30 [#allocation12]  ;;  %p811_p4 = scmp.ge.s32.totalorder %s814_s20, 4  }
 0x192   : >> { %s1447_s5 = scvt.s32.f32 %s1446_s27  ;;  %s1780_s11 = sshll.u32 (%p811_p4), %s2377_s16, 8 }
 0x193   : >> { %1039 = vmatpush1.bf16.msra.mxu0 %v1984_v39  ;;  %1080 = vmatpush1.bf16.msra.mxu1 %v1991_v43  ;;  %s1480_s25 = sshll.u32 (%p811_p4), %s383_s24, 4  ;;  %s2856_s20 = sand.u32 (%p811_p4), 1, %s2251_s13   ;;  %s2698_s25 = int_to_ptr.vmem [resolvable:$true] %s1480_s25 }
 0x194   : >> { %1312 = vmatprep.subr.bf16.mxu0 %v1990_v41  ;;  %1353 = vmatprep.subr.bf16.mxu1 %v1997_v45  ;;  %s1450_s15 = ssub.f32 1.0, %s1447_s5  ;;  %s2702_s18 = scalar_lea.sflag (%p811_p4), [#allocation8], %s2856_s20 }
 0x195   : > { %s2113_s26 = scalar_lea.vmem (%p811_p4), %s2698_s25, 256  ;;  %p2857_p10 = scmp.ne.s32.totalorder (%p811_p4), %s2834_s23, 0 }
 0x196   : >> { %1057 = vmatmul.mubr.bf16.vlgmr.msra.gmra.mrb[0].mxu0 %v831_v42  ;;  %1098 = vmatmul.mubr.bf16.vlgmr.msra.gmra.mrb[0].mxu1 %v831_v42  ;;  %p2114_p9 = scmp.ne.s32.totalorder (%p811_p4), %s2698_s25, %s2113_s26 }
 0x197   : >> { %1313 = vmatpush1.bf16.msra.mxu0 %v1988_v44  ;;  %1344 = vmatprep.mubr.bf16.mxu0 %v2286_v7 }
 0x198   : >> { %1314 = vmatprep.subr.bf16.mxu0 %v1994_v46  ;;  %1354 = vmatpush1.bf16.msra.mxu1 %v1995_v47  ;;  %v1115_v46 = vld [vmem:[%s1114_s19] sm:$0xff]  ;;  %v1116_v47 = vld [vmem:[%s1114_s19 + $0x8] sm:$0xff]  ;;  %p2115_p13 = pnand (%p811_p4), %p2114_p9, %p2857_p10 }
 0x199   : >> { %1385 = vmatprep.mubr.bf16.mxu1 %v2286_v7  ;;  %1355 = vmatprep.subr.bf16.mxu1 %v2003_v49  ;;  %v2028_v7 = vld [vmem:[#allocation9 + $0xe0] ss:$16 sps:$4 sm:$0xff]  }
 0x19a   : > { %p2116_p2 = pneg (%p811_p4), %p2115_p13 }
 0x19b   : >> { %1315 = vmatpush1.bf16.msra.mxu0 %v1992_v48 }
 0x19c   : >> { %1316 = vmatprep.subr.bf16.mxu0 %v2000_v50  ;;  %1356 = vmatpush1.bf16.msra.mxu1 %v2001_v33  ;;  %v1117_v33 = vld [vmem:[%s1114_s19 + $0x10] sm:$0xff] }
 0x19d   : >> { %1357 = vmatprep.subr.bf16.mxu1 %v2009_v52 }
 0x19f   : >> { %1317 = vmatpush1.bf16.msra.mxu0 %v1998_v51 }
 0x1a0   : >> { %1318 = vmatprep.subr.bf16.mxu0 %v2006_v53  ;;  %1358 = vmatpush1.bf16.msra.mxu1 %v2007_v54 }
 0x1a1   : >> { %1359 = vmatprep.subr.bf16.mxu1 %v2015_v56 }
 0x1a3   : >> { %1319 = vmatpush1.bf16.msra.mxu0 %v2004_v55 }
 0x1a4   : >> { %1320 = vmatprep.subr.bf16.mxu0 %v2012_v57  ;;  %1360 = vmatpush1.bf16.msra.mxu1 %v2013_v58 }
 0x1a5   : >> { %1361 = vmatprep.subr.bf16.mxu1 %v2021_v60 }
 0x1a7   : >> { %1321 = vmatpush1.bf16.msra.mxu0 %v2010_v59 }
 0x1a8   : >> { %1322 = vmatprep.subr.bf16.mxu0 %v2018_v61  ;;  %1362 = vmatpush1.bf16.msra.mxu1 %v2019_v62 }
 0x1a9   : >> { %1363 = vmatprep.subr.bf16.mxu1 %v2027_v0 }
 0x1ab   : >> { %1323 = vmatpush1.bf16.msra.mxu0 %v2016_v63  ;;  %v1118_v63 = vld [vmem:[%s1114_s19 + $0x18] sm:$0xff]  ;;  %s2694_s19 = scalar_lea.hbm (%p811_p4), %s2806_s8, %s1780_s11 }
 0x1ac   : >> { %1324 = vmatprep.subr.bf16.mxu0 %v2024_v1  ;;  %1364 = vmatpush1.bf16.msra.mxu1 %v2025_v2 }
 0x1ad   : >> { %1365 = vmatprep.subr.bf16.mxu1 %v2033_v4 }
 0x1af   : >> { %1325 = vmatpush1.bf16.msra.mxu0 %v2022_v3 }
 0x1b0   : >> { %1326 = vmatprep.subr.bf16.mxu0 %v2030_v5  ;;  %1366 = vmatpush1.bf16.msra.mxu1 %v2031_v6 }
 0x1b1   : >> { %1367 = vmatprep.subr.bf16.mxu1 %v2036_v8 }
 0x1b3   : >> { %1327 = vmatpush1.bf16.msra.mxu0 %v2028_v7 }
 0x1b4   : >> { %1368 = vmatpush1.bf16.msra.mxu1 %v2034_v10  ;;  %v1451_v10 = vstv %s1450_s15 }
 0x1b6   : >> { %1345 = vmatmul.mubr.bf16.vlgmr.msra.gmra.mrb[4].mxu0 %v1119_v9 }
 0x1b7   : >> { %1386 = vmatmul.mubr.bf16.vlgmr.msra.gmra.mrb[4].mxu1 %v1119_v9 }
 0x269   : >> { %v1058_v13 = vpop.f32.mrb[0].mxu0  ;;  %v1099_v21 = vpop.f32.mrb[0].mxu1 }
 0x26a   : >> { %v1106_v14 = vadd.f32 %v1058_v13, %v827_v11  ;;  %v1060_v15 = vpop.f32.mrb[1].mxu0  ;;  %v1108_v23 = vadd.f32 %v1099_v21, %v829_v16  ;;  %v1101_v24 = vpop.f32.mrb[1].mxu1  ;;  %v1448_v13 = vstv %s1447_s5 }
 0x26b   : >> { %v1107_v17 = vadd.f32 %v1060_v15, %v828_v12  ;;  %v1062_v18 = vpop.f32.mrb[2].mxu0  ;;  %v1103_v25 = vpop.f32.mrb[2].mxu1  ;;  %v1109_v28 = vadd.f32 %v1101_v24, %v830_v26 }
 0x26c   : >> { %v1398_v19 = vmul.f32 0.5, %v1106_v14  ;;  %v1063_v20 = vpop.f32.mrb[3].mxu0  ;;  %v1104_v27 = vpop.f32.mrb[3].mxu1  ;;  %v1455_v14 = vmul.f32 %v2263_v36, %v1451_v10 }
 0x26d   : >> { %v1402_v22 = vmul.f32 0.5, %v1107_v17  ;;  %v1407_v29 = vmul.f32 0.5, %v1109_v28 }
 0x26e   : >> { %2037 = vtanh.f32 %v1398_v19 }
 0x26f   : >> { %2039 = vtanh.f32 %v1402_v22  ;;  %v1452_v22 = vmul.f32 %v2267_v35, %v1451_v10 }
 0x270   : >> { %2041 = vtanh.f32 %v1108_v23 }
 0x271   : >> { %2043 = vtanh.f32 %v1407_v29 }
 0x278   : >> { %v2038_v30 = vpop.eup %2037 }
 0x279   : >> { %v2040_v31 = vpop.eup %2039  ;;  %v1400_v32 = vadd.f32 1.0, %v2038_v30 }
 0x27a   : >> { %v2042_v37 = vpop.eup %2041  ;;  %v1404_v38 = vadd.f32 1.0, %v2040_v31 }
 0x27b   : >> { %v1401_v39 = vmul.f32 0.5, %v1400_v32  ;;  %v2044_v44 = vpop.eup %2043 }
 0x27c   : >> { %v1405_v40 = vmul.f32 0.5, %v1404_v38  ;;  %v1409_v45 = vadd.f32 1.0, %v2044_v44 }
 0x27d   : >> { %v1412_v41 = vmul.f32 %v2042_v37, %v1401_v39 }
 0x27e   : >> { %v1411_v42 = vmul.f32 %v2271_v34, %v1405_v40  ;;  %v1410_v51 = vmul.f32 0.5, %v1409_v45 }
 0x280   : >> { %v2661_v34 = vadd.f32 %v1412_v41, %v1411_v42  }
 0x282   : >> { %v2851_v43 = vmov %v2661_v34 }
 0x283   : >> { %2045 = vtanh.f32 %v2851_v43  ;;  %1458 = vst [vmem:[#allocation5] sm:$0xff] (%p811_p4), %v2851_v43 }
 0x289   : >> { %v1346_v48 = vpop.f32.mrb[4].mxu0 }
 0x28a   : >> { %v1394_v49 = vadd.f32 %v1346_v48, %v1115_v46  ;;  %v1348_v50 = vpop.f32.mrb[5].mxu0  ;;  %v1387_v56 = vpop.f32.mrb[4].mxu1 }
 0x28b   : >> { %v1395_v52 = vadd.f32 %v1348_v50, %v1116_v47  ;;  %v1350_v53 = vpop.f32.mrb[6].mxu0  ;;  %v1396_v59 = vadd.f32 %v1387_v56, %v1117_v33  ;;  %v1389_v60 = vpop.f32.mrb[5].mxu1 }
 0x28c   : >> { %v1416_v54 = vmul.f32 0.5, %v1394_v49  ;;  %v1351_v55 = vpop.f32.mrb[7].mxu0  ;;  %v1391_v61 = vpop.f32.mrb[6].mxu1  ;;  %v1397_v1 = vadd.f32 %v1389_v60, %v1118_v63 }
 0x28d   : >> { %v2046_v34 = vpop.eup %2045  ;;  %v1420_v58 = vmul.f32 0.5, %v1395_v52  ;;  %v1392_v0 = vpop.f32.mrb[7].mxu1 }
 0x28e   : >> { %v1415_v57 = vmul.f32 %v2046_v34, %v1410_v51   ;;  %2047 = vtanh.f32 %v1416_v54  ;;  %v1425_v2 = vmul.f32 0.5, %v1397_v1  ;;  %v2854_v34 = vmov %v2851_v43 }
 0x28f   : >> { %2049 = vtanh.f32 %v1420_v58 }
 0x290   : >> { %v1434_v62 = vpack.c.bf16 %v1415_v57, %v1415_v57  ;;  %2051 = vtanh.f32 %v1396_v59  ;;  %v2855_v33 = vmov %v1415_v57  ;;  %1457 = vst [vmem:[#allocation4] sm:$0xff] (%p811_p4), %v1415_v57 }
 0x291   : >> { %2053 = vtanh.f32 %v1425_v2 }
 0x292   : >> { %1437 = vst [vmem:[%s1436_s4] sm:$0xf] %v1434_v62  ;;  %s2287_s4 = smov (%p811_p4), [#allocation11]  }
 0x293   : > { %s2117_s27 = sshll.u32 (%p811_p4), %s2287_s4, 4  ;;  %s2118_s27 = int_to_ptr.vmem [resolvable:$false] %s2117_s27 }
 0x294   : > { %s2119_s5 = scalar_lea.vmem (%p811_p4), %s2118_s27, 512  ;;  %p2120_p0 = scmp.lt.s32.totalorder (%p811_p4), %s2698_s25, %s2118_s27 }
 0x295   : > { %p2121_p5 = scmp.lt.s32.totalorder (%p811_p4), %s2119_s5, %s2113_s26 }
 0x297   : > { %p2122_p8 = por (%p811_p4), %p2121_p5, %p2120_p0 }
 0x298   : >> { %v2048_v3 = vpop.eup %2047 }
 0x299   : >> { %v2050_v4 = vpop.eup %2049  ;;  %v1418_v5 = vadd.f32 1.0, %v2048_v3  ;;  %p2123_p6 = pnand (%p811_p4), %p2122_p8, %p2116_p2 }
 0x29a   : >> { %v2052_v6 = vpop.eup %2051  ;;  %v1422_v7 = vadd.f32 1.0, %v2050_v4 }
 0x29b   : >> { %v1419_v8 = vmul.f32 0.5, %v1418_v5  ;;  %v2054_v17 = vpop.eup %2053 }
 0x29c   : >> { %v1423_v9 = vmul.f32 0.5, %v1422_v7  ;;  %v1427_v19 = vadd.f32 1.0, %v2054_v17 }
 0x29d   : >> { %v1430_v11 = vmul.f32 %v2052_v6, %v1419_v8 }
 0x29e   : >> { %v1429_v12 = vmul.f32 %v2263_v36, %v1423_v9  ;;  %v1428_v20 = vmul.f32 0.5, %v1427_v19 }
 0x2a0   : >> { %v1431_v15 = vadd.f32 %v1430_v11, %v1429_v12 }
 0x2a2   : >> { %2055 = vtanh.f32 %v1431_v15  ;;  %v1454_v16 = vmul.f32 %v1448_v13, %v1431_v15 }
 0x2a4   : >> { %v1456_v18 = vadd.f32 %v1455_v14, %v1454_v16  }
 0x2a6   : >> { %v2852_v36 = vmov %v1456_v18  ;;  %1460 = vst [vmem:[#allocation5 + $0x8] sm:$0xff] (%p811_p4), %v1456_v18 }
 0x2ac   : >> { %v2056_v21 = vpop.eup %2055 }
 0x2ad   : >> { %v1433_v23 = vmul.f32 %v2056_v21, %v1428_v20  ;;  %813 = sbr.rel (!%p811_p4) target bundleno = 372 (0x174), region = 133 }
 0x2af   : >> { %v1438_v24 = vpack.c.bf16 %v1433_v23, %v1433_v23  ;;  %v1449_v25 = vmul.f32 %v1448_v13, %v1433_v23 }
 0x2b1   : >> { %1441 = vst [vmem:[%s1440_s12] sm:$0xf] %v1438_v24  ;;  %v1453_v26 = vadd.f32 %v1452_v22, %v1449_v25  }
 0x2b3   : >> { %v2853_v35 = vmov %v1453_v26  ;;  %1459 = vst [vmem:[#allocation4 + $0x8] sm:$0xff] (%p811_p4), %v1453_v26 }
 0x2b4   : > { %2126 = shalt.err (!%p2123_p6)
}
 0x2b5   : > { %s2127_s24 = scalar_lea.hbm %s2694_s19, 256  ;;  %s2131_s30 = scalar_lea.hbm %s2806_s8, 768 }
 0x2b6   : > { %p2128_p11 = scmp.ne.s32.totalorder %s2694_s19, %s2127_s24  ;;  %p2132_p1 = scmp.lt.u32.totalorder %s2694_s19, %s2806_s8 }
 0x2b7   : > { %p2133_p3 = scmp.lt.u32.totalorder %s2131_s30, %s2127_s24  ;;  %p2135_p9 = scmp.lt.u32.totalorder %s2127_s24, %s2694_s19 }
 0x2b8   : > { %p2129_p7 = pnand %p2128_p11, %p2857_p10 }
 0x2b9   : > { %p2134_p4 = por %p2133_p3, %p2132_p1 }
 0x2ba   : > { %p2130_p12 = pneg %p2129_p7 }
 0x2bb   : > { %p2136_p13 = por %p2135_p9, %p2134_p4 }
 0x2bd   : > { %p2137_p2 = pnand %p2136_p13, %p2130_p12 }
 0x2bf   : > { %2140 = shalt.err (!%p2137_p2)
}
 0x2c0   : > { %s2288_s29 = smov 64   ;;  %s2289_s22 = smov 4  }
 0x2c1   : > { %1790 = dma.vmem_to_hbm [thread:$0]  (%p2857_p10), %s2698_s25, 256, %s2694_s19, %s2702_s18, %s2288_s29, %s2288_s29, %s2289_s22  }
 0x2c2   : > { %s2858_s20 = ssub.s32 2, %s2377_s16  ;;  %s1497_s4 = sshll.u32 %s390_s14, 4  ;;  %s2738_s4 = int_to_ptr.vmem [resolvable:$true] %s1497_s4 }
 0x2c3   : > { %s1781_s26 = sshll.u32 %s2858_s20, 8  ;;  %s2859_s21 = sand.u32 1, %s2239_s10  }
 0x2c4   : > { %s2736_s24 = scalar_lea.hbm %s2807_s9, %s1781_s26  ;;  %s2742_s23 = scalar_lea.sflag [#allocation13], %s2859_s21 }
 0x2c5   : > { %s2141_s15 = scalar_lea.vmem %s2738_s4, 256  ;;  %p2860_p10 = scmp.ne.s32.totalorder %s2838_s17, 0 }
 0x2c6   : > { %p2142_p0 = scmp.ne.s32.totalorder %s2738_s4, %s2141_s15  ;;  %s2290_s16 = smov [#allocation12]  }
 0x2c7   : > { %s2145_s28 = sshll.u32 %s2290_s16, 4  ;;  %s2146_s28 = int_to_ptr.vmem [resolvable:$false] %s2145_s28 }
 0x2c8   : > { %p2143_p5 = pnand %p2142_p0, %p2860_p10  ;;  %s2147_s14 = scalar_lea.vmem %s2146_s28, 512 }
 0x2c9   : > { %p2148_p6 = scmp.lt.s32.totalorder %s2738_s4, %s2146_s28  ;;  %p2149_p11 = scmp.lt.s32.totalorder %s2147_s14, %s2141_s15 }
 0x2ca   : > { %p2144_p8 = pneg %p2143_p5 }
 0x2cb   : > { %p2150_p7 = por %p2149_p11, %p2148_p6 }
 0x2cd   : > { %p2151_p12 = pnand %p2150_p7, %p2144_p8 }
 0x2cf   : > { %2154 = shalt.err (!%p2151_p12)
}
 0x2d0   : > { %s2155_s19 = scalar_lea.hbm %s2736_s24, 256  ;;  %s2159_s30 = scalar_lea.hbm %s2807_s9, 768 }
 0x2d1   : > { %p2156_p1 = scmp.ne.s32.totalorder %s2736_s24, %s2155_s19  ;;  %p2160_p9 = scmp.lt.u32.totalorder %s2736_s24, %s2807_s9 }
 0x2d2   : > { %p2161_p13 = scmp.lt.u32.totalorder %s2159_s30, %s2155_s19  ;;  %p2163_p0 = scmp.lt.u32.totalorder %s2155_s19, %s2736_s24 }
 0x2d3   : > { %p2157_p3 = pnand %p2156_p1, %p2860_p10 }
 0x2d4   : > { %p2162_p2 = por %p2161_p13, %p2160_p9 }
 0x2d5   : > { %p2158_p4 = pneg %p2157_p3 }
 0x2d6   : > { %p2164_p5 = por %p2163_p0, %p2162_p2 }
 0x2d8   : > { %p2165_p8 = pnand %p2164_p5, %p2158_p4 }
 0x2da   : > { %2168 = shalt.err (!%p2165_p8)
}
 0x2db   : > { %1791 = dma.vmem_to_hbm [thread:$0]  (%p2860_p10), %s2738_s4, 256, %s2736_s24, %s2742_s23, %s2288_s29, %s2288_s29, %s2289_s22  }
 0x2dc PF: > { %s2861_s20 = sld [smem:[#allocation22_spill]]  ;;  %s2862_s26 = sld [smem:[#allocation20_spill]] }
 0x2dd   : > { %s2863_s27 = sld [smem:[#allocation25_spill]] }
 0x2e2   : > { %p1812_p6 = scmp.ge.s32.totalorder %s2861_s20, 2  ;;  %s1512_s5 = sand.u32 1, %s2862_s26  }
 0x2e3   : > { %p2864_p11 = scmp.ne.s32.totalorder %s2863_s27, 0  ;;  %s1513_s21 = scalar_lea.sflag [#allocation8], %s1512_s5 }
 0x2e5   : > { %p1802_p7 = pnand %p1812_p6, %p2864_p11 }
 0x2e7   : > { %2226 = dma.done.wait (!%p1802_p7), %s1513_s21, 256  }
 0x2e8   : > { %2228 = vsyncadd (!%p1802_p7), %s1513_s21, 4294967040  ;;  %s2865_s15 = sld [smem:[#allocation18_spill]]  ;;  %s2866_s17 = sld [smem:[#allocation27_spill]] }
 0x2ee   : > { %s1521_s16 = sand.u32 1, %s2865_s15   ;;  %p2867_p12 = scmp.ne.s32.totalorder %s2866_s17, 0 }
 0x2ef   : > { %s1522_s28 = scalar_lea.sflag [#allocation13], %s1521_s16 }
 0x2f0   : > { %p1805_p1 = pnand %p1812_p6, %p2867_p12 }
 0x2f2   : > { %2230 = dma.done.wait (!%p1805_p1), %s1522_s28, 256  }
 0x2f3   : > { %2232 = vsyncadd (!%p1805_p1), %s1522_s28, 4294967040  ;;  %s2868_s15 = sld [smem:[#allocation23_spill]]  ;;  %s2869_s29 = sld [smem:[#allocation19_spill]] }
 0x2f4   : > { %s2870_s11 = sld [smem:[#allocation26_spill]]  ;;  %s2871_s22 = sld [smem:[#allocation21_spill]] }
 0x2f5   : > { %s2872_s14 = sld [smem:[#allocation24_spill]]  ;;  %s2873_s30 = smov %s2239_s10 }
 0x2f6   : > { %s2875_s12 = smov %s2251_s13 }
 0x2f9   : > { %p25_p10 = scmp.ge.s32.totalorder %s2868_s15, 5   ;;  %s2874_s10 = smov %s2869_s29 }
 0x2fa   : > { %s2876_s13 = smov %s2871_s22 }
 0x2fb   :  { %27 = sbr.rel (!%p25_p10) target bundleno = 12 (0xc), region = 144 }
 0x302   :  { %1527 = vsyncpa [#allocation7], 1 }
 0x303   :  { %1529 = vsyncpa [#allocation7 + $0x1], 1 }
 0x304   :  { %1530 = vsyncpa [#allocation10], 1 }
 0x305   :  { %1531 = vsyncpa [#allocation8], 1 }
 0x306   :  { %1533 = vsyncpa [#allocation8 + $0x1], 1 }
 0x307   :  { %1534 = vsyncpa [#allocation13], 1 }
 0x308   :  { %1536 = vsyncpa [#allocation13 + $0x1], 1 }

</bundles_post_ra>
